<compile_context>
chip_gen: v5e
topology: v5e:2x2
jax: 0.10.0
libtpu: 0.0.40
codegen_flags: <defaults>
</compile_context>

<pallas_src>
import jax
import jax.numpy as jnp
from jax.experimental import pallas as pl
from jax.experimental.pallas import tpu as pltpu


def _round_up(x, m):
    return (x + m - 1) // m * m


def _pick_row_tile(nh, nw, target_rows=512):
    """Largest divisor of nh whose tile (row_tile * nw patches) stays <= target_rows."""
    best = 1
    for tr in range(1, nh + 1):
        if nh % tr == 0 and tr * nw <= target_rows:
            best = tr
    return best


def _make_kernel(C, P, nw, row_tile, K, K_pad, fused):
    pad = K_pad - K

    def kernel(x_ref, w_ref, pb_ref, out_ref):
        # fused:   x_ref is (C, row_tile, P, nw, P)  raw pixels for row_tile patch rows
        # unfused: x_ref is (row_tile, nw, K_pad)    pre-built patches
        # w_ref:   (K_pad, D)        conv weight as projection matrix (zero-padded rows)
        # pb_ref:  (row_tile, nw, D) positional embedding with conv bias folded in
        # out_ref: (row_tile, nw, D)
        w = w_ref[...]
        for r in range(row_tile):                      # static unroll, row_tile is small
            if fused:
                # Each (c, ph) slice is already (patch_index, pw)-oriented; placing
                # the slices side-by-side along lanes reproduces the (c, ph, pw)
                # feature ordering of the reshaped conv weight. XLU/VALU work only.
                pieces = [x_ref[c, r, ph] for c in range(C) for ph in range(P)]
                if pad:
                    pieces.append(jnp.zeros((nw, pad), dtype=pieces[0].dtype))
                patch = jnp.concatenate(pieces, axis=1)            # (nw, K_pad)
            else:
                patch = x_ref[r]                                   # (nw, K_pad)
            acc = jnp.dot(patch, w, preferred_element_type=jnp.float32)   # (nw, D) f32
            acc = acc + pb_ref[r].astype(jnp.float32)
            out_ref[r] = acc.astype(out_ref.dtype)

    return kernel


def siglip_vision_embeddings(pixel_values, conv_weight, conv_bias, pos_embedding,
                             *, row_tile=None, fuse_patchify=True,
                             vmem_limit_bytes=48 * 1024 * 1024):
    """pixel_values: [B, C, H, W] (NCHW), conv_weight: [D, C, P, P],
       conv_bias: [D], pos_embedding: [N, D]  ->  [B, N, D]."""
    B, C, H, W = pixel_values.shape
    D, Cw, P, Pw = conv_weight.shape
    assert Cw == C and Pw == P
    assert H % P == 0 and W % P == 0
    nh, nw = H // P, W // P
    N = nh * nw
    assert pos_embedding.shape == (N, D)
    K = C * P * P
    K_pad = _round_up(K, 128)

    if row_tile is None:
        row_tile = _pick_row_tile(nh, nw)
    assert nh % row_tile == 0
    n_tiles = nh // row_tile

    # ---- glue: free reshapes for the pixel stream, tiny one-time parameter prep ----
    w = conv_weight.reshape(D, K).T                    # (K, D)
    if K_pad != K:
        w = jnp.pad(w, ((0, K_pad - K), (0, 0)))
    # Fold conv bias into the positional table (one-time prep in a real model).
    pb = (pos_embedding + conv_bias[None, :]).reshape(nh, nw, D)

    if fuse_patchify:
        x = pixel_values.reshape(B * C, nh, P, nw, P)  # pure reshape, no HBM transpose
        x_spec = pl.BlockSpec((C, row_tile, P, nw, P),
                              lambda b, t: (b, t, 0, 0, 0))
    else:
        # Fallback path: materialize patches in HBM (more traffic, same math).
        patches = pixel_values.reshape(B, C, nh, P, nw, P).transpose(0, 2, 4, 1, 3, 5)
        patches = patches.reshape(B * nh, nw, K)
        if K_pad != K:
            patches = jnp.pad(patches, ((0, 0), (0, 0), (0, K_pad - K)))
        x = patches
        x_spec = pl.BlockSpec((row_tile, nw, K_pad),
                              lambda b, t: (b * n_tiles + t, 0, 0))

    kernel = _make_kernel(C=C, P=P, nw=nw, row_tile=row_tile,
                          K=K, K_pad=K_pad, fused=fuse_patchify)

    out = pl.pallas_call(
        kernel,
        out_shape=jax.ShapeDtypeStruct((B * nh, nw, D), pixel_values.dtype),
        grid_spec=pltpu.PrefetchScalarGridSpec(
            num_scalar_prefetch=0,
            grid=(B, n_tiles),
            in_specs=[
                x_spec,
                pl.BlockSpec((K_pad, D), lambda b, t: (0, 0)),
                pl.BlockSpec((row_tile, nw, D), lambda b, t: (t, 0, 0)),
            ],
            out_specs=pl.BlockSpec((row_tile, nw, D),
                                   lambda b, t: (b * n_tiles + t, 0, 0)),
        ),
        compiler_params=pltpu.CompilerParams(
            dimension_semantics=("parallel", "parallel"),
            vmem_limit_bytes=vmem_limit_bytes,
        ),
    )(x, w, pb)
    return out.reshape(B, N, D)


def _reference(pixel_values, conv_weight, conv_bias, pos_embedding):
    B, C, H, W = pixel_values.shape
    D, _, P, _ = conv_weight.shape
    nh, nw = H // P, W // P
    N, K = nh * nw, C * P * P
    patches = pixel_values.reshape(B, C, nh, P, nw, P).transpose(0, 2, 4, 1, 3, 5)
    patches = patches.reshape(B, N, K)
    out = patches @ conv_weight.reshape(D, K).T + conv_bias[None, None, :]
    return out + pos_embedding[None, :, :]


if __name__ == "__main__":
    key = jax.random.PRNGKey(0)
    k_px, k_w, k_b, k_pos, k_px2, k_w2, k_b2, k_pos2 = jax.random.split(key, 8)

    # Config 1: small shapes consistent with the module
    #   num_channels=4, image_size=16, patch_size=4, hidden_size=32 -> N=16, K=64.
    B, C, IMG, P, D = 2, 4, 16, 4, 32
    N = (IMG // P) ** 2
    px = jax.random.normal(k_px, (B, C, IMG, IMG), dtype=jnp.float32)
    cw = jax.random.normal(k_w, (D, C, P, P), dtype=jnp.float32) * 0.02
    cb = jax.random.normal(k_b, (D,), dtype=jnp.float32) * 0.02
    pe = jax.random.normal(k_pos, (N, D), dtype=jnp.float32) * 0.02

    fused = True
    try:
        out1 = jax.block_until_ready(siglip_vision_embeddings(px, cw, cb, pe))
    except Exception:
        # Safety net for Mosaic builds that cannot lower the in-kernel lane
        # concatenation: fall back to pre-built patches (same math).
        fused = False
        out1 = jax.block_until_ready(
            siglip_vision_embeddings(px, cw, cb, pe, fuse_patchify=False))
    ref1 = _reference(px, cw, cb, pe)
    assert out1.shape == (B, N, D)
    assert jnp.allclose(out1, ref1, atol=1e-4, rtol=1e-4), "config-1 mismatch"

    # Config 2: exercises the multi-step N-tiled grid (row_tile=2 -> grid (1, 3)),
    # odd channel count, and K padding (K=48 -> 128).
    B2, C2, IMG2, P2, D2 = 1, 3, 24, 4, 64
    N2 = (IMG2 // P2) ** 2
    px2 = jax.random.normal(k_px2, (B2, C2, IMG2, IMG2), dtype=jnp.float32)
    cw2 = jax.random.normal(k_w2, (D2, C2, P2, P2), dtype=jnp.float32) * 0.02
    cb2 = jax.random.normal(k_b2, (D2,), dtype=jnp.float32) * 0.02
    pe2 = jax.random.normal(k_pos2, (N2, D2), dtype=jnp.float32) * 0.02
    out2 = jax.block_until_ready(
        siglip_vision_embeddings(px2, cw2, cb2, pe2, row_tile=2, fuse_patchify=fused))
    ref2 = _reference(px2, cw2, cb2, pe2)
    assert out2.shape == (B2, N2, D2)
    assert jnp.allclose(out2, ref2, atol=1e-4, rtol=1e-4), "config-2 mismatch"

    print("KERNEL_OK")
</pallas_src>

<mosaic_0001>
module attributes {stable_mosaic.version = 11 : i64} {
  func.func @kernel(%arg0: i32, %arg1: i32, %arg2: memref<4x4x4x4x4xf32, #tpu.memory_space<vmem>>, %arg3: memref<128x32xf32, #tpu.memory_space<vmem>>, %arg4: memref<4x4x32xf32, #tpu.memory_space<vmem>>, %arg5: memref<4x4x32xf32, #tpu.memory_space<vmem>>) attributes {dimension_semantics = [#tpu.dimension_semantics<parallel>, #tpu.dimension_semantics<parallel>], iteration_bounds = array<i64: 2, 1>, scalar_prefetch = 0 : i64, scratch_operands = 0 : i64, tpu.core_type = #tpu.core_type<tc>, window_params = [{transform_indices = @transform_0, window_bounds = array<i64: 4, 4, 4, 4, 4>}, {pipeline_mode = #tpu.pipeline_mode<synchronous>, transform_indices = @transform_1, window_bounds = array<i64: 128, 32>}, {transform_indices = @transform_2, window_bounds = array<i64: 4, 4, 32>}, {transform_indices = @transform_3, window_bounds = array<i64: 4, 4, 32>}]} {
    %c0 = arith.constant 0 : index
    %c0_0 = arith.constant 0 : index
    %0 = vector.load %arg3[%c0, %c0_0] : memref<128x32xf32, #tpu.memory_space<vmem>>, vector<128x32xf32>
    %c0_1 = arith.constant 0 : index
    %c0_2 = arith.constant 0 : index
    %c0_3 = arith.constant 0 : index
    %c0_4 = arith.constant 0 : index
    %c0_5 = arith.constant 0 : index
    %1 = vector.load %arg2[%c0_1, %c0_2, %c0_3, %c0_4, %c0_5] : memref<4x4x4x4x4xf32, #tpu.memory_space<vmem>>, vector<1x1x1x4x4xf32>
    %2 = vector.shape_cast %1 : vector<1x1x1x4x4xf32> to vector<4x4xf32>
    %c0_6 = arith.constant 0 : index
    %c0_7 = arith.constant 0 : index
    %c1 = arith.constant 1 : index
    %c0_8 = arith.constant 0 : index
    %c0_9 = arith.constant 0 : index
    %3 = vector.load %arg2[%c0_6, %c0_7, %c1, %c0_8, %c0_9] : memref<4x4x4x4x4xf32, #tpu.memory_space<vmem>>, vector<1x1x1x4x4xf32>
    %4 = vector.shape_cast %3 : vector<1x1x1x4x4xf32> to vector<4x4xf32>
    %c0_10 = arith.constant 0 : index
    %c0_11 = arith.constant 0 : index
    %c2 = arith.constant 2 : index
    %c0_12 = arith.constant 0 : index
    %c0_13 = arith.constant 0 : index
    %5 = vector.load %arg2[%c0_10, %c0_11, %c2, %c0_12, %c0_13] : memref<4x4x4x4x4xf32, #tpu.memory_space<vmem>>, vector<1x1x1x4x4xf32>
    %6 = vector.shape_cast %5 : vector<1x1x1x4x4xf32> to vector<4x4xf32>
    %c0_14 = arith.constant 0 : index
    %c0_15 = arith.constant 0 : index
    %c3 = arith.constant 3 : index
    %c0_16 = arith.constant 0 : index
    %c0_17 = arith.constant 0 : index
    %7 = vector.load %arg2[%c0_14, %c0_15, %c3, %c0_16, %c0_17] : memref<4x4x4x4x4xf32, #tpu.memory_space<vmem>>, vector<1x1x1x4x4xf32>
    %8 = vector.shape_cast %7 : vector<1x1x1x4x4xf32> to vector<4x4xf32>
    %c1_18 = arith.constant 1 : index
    %c0_19 = arith.constant 0 : index
    %c0_20 = arith.constant 0 : index
    %c0_21 = arith.constant 0 : index
    %c0_22 = arith.constant 0 : index
    %9 = vector.load %arg2[%c1_18, %c0_19, %c0_20, %c0_21, %c0_22] : memref<4x4x4x4x4xf32, #tpu.memory_space<vmem>>, vector<1x1x1x4x4xf32>
    %10 = vector.shape_cast %9 : vector<1x1x1x4x4xf32> to vector<4x4xf32>
    %c1_23 = arith.constant 1 : index
    %c0_24 = arith.constant 0 : index
    %c1_25 = arith.constant 1 : index
    %c0_26 = arith.constant 0 : index
    %c0_27 = arith.constant 0 : index
    %11 = vector.load %arg2[%c1_23, %c0_24, %c1_25, %c0_26, %c0_27] : memref<4x4x4x4x4xf32, #tpu.memory_space<vmem>>, vector<1x1x1x4x4xf32>
    %12 = vector.shape_cast %11 : vector<1x1x1x4x4xf32> to vector<4x4xf32>
    %c1_28 = arith.constant 1 : index
    %c0_29 = arith.constant 0 : index
    %c2_30 = arith.constant 2 : index
    %c0_31 = arith.constant 0 : index
    %c0_32 = arith.constant 0 : index
    %13 = vector.load %arg2[%c1_28, %c0_29, %c2_30, %c0_31, %c0_32] : memref<4x4x4x4x4xf32, #tpu.memory_space<vmem>>, vector<1x1x1x4x4xf32>
    %14 = vector.shape_cast %13 : vector<1x1x1x4x4xf32> to vector<4x4xf32>
    %c1_33 = arith.constant 1 : index
    %c0_34 = arith.constant 0 : index
    %c3_35 = arith.constant 3 : index
    %c0_36 = arith.constant 0 : index
    %c0_37 = arith.constant 0 : index
    %15 = vector.load %arg2[%c1_33, %c0_34, %c3_35, %c0_36, %c0_37] : memref<4x4x4x4x4xf32, #tpu.memory_space<vmem>>, vector<1x1x1x4x4xf32>
    %16 = vector.shape_cast %15 : vector<1x1x1x4x4xf32> to vector<4x4xf32>
    %c2_38 = arith.constant 2 : index
    %c0_39 = arith.constant 0 : index
    %c0_40 = arith.constant 0 : index
    %c0_41 = arith.constant 0 : index
    %c0_42 = arith.constant 0 : index
    %17 = vector.load %arg2[%c2_38, %c0_39, %c0_40, %c0_41, %c0_42] : memref<4x4x4x4x4xf32, #tpu.memory_space<vmem>>, vector<1x1x1x4x4xf32>
    %18 = vector.shape_cast %17 : vector<1x1x1x4x4xf32> to vector<4x4xf32>
    %c2_43 = arith.constant 2 : index
    %c0_44 = arith.constant 0 : index
    %c1_45 = arith.constant 1 : index
    %c0_46 = arith.constant 0 : index
    %c0_47 = arith.constant 0 : index
    %19 = vector.load %arg2[%c2_43, %c0_44, %c1_45, %c0_46, %c0_47] : memref<4x4x4x4x4xf32, #tpu.memory_space<vmem>>, vector<1x1x1x4x4xf32>
    %20 = vector.shape_cast %19 : vector<1x1x1x4x4xf32> to vector<4x4xf32>
    %c2_48 = arith.constant 2 : index
    %c0_49 = arith.constant 0 : index
    %c2_50 = arith.constant 2 : index
    %c0_51 = arith.constant 0 : index
    %c0_52 = arith.constant 0 : index
    %21 = vector.load %arg2[%c2_48, %c0_49, %c2_50, %c0_51, %c0_52] : memref<4x4x4x4x4xf32, #tpu.memory_space<vmem>>, vector<1x1x1x4x4xf32>
    %22 = vector.shape_cast %21 : vector<1x1x1x4x4xf32> to vector<4x4xf32>
    %c2_53 = arith.constant 2 : index
    %c0_54 = arith.constant 0 : index
    %c3_55 = arith.constant 3 : index
    %c0_56 = arith.constant 0 : index
    %c0_57 = arith.constant 0 : index
    %23 = vector.load %arg2[%c2_53, %c0_54, %c3_55, %c0_56, %c0_57] : memref<4x4x4x4x4xf32, #tpu.memory_space<vmem>>, vector<1x1x1x4x4xf32>
    %24 = vector.shape_cast %23 : vector<1x1x1x4x4xf32> to vector<4x4xf32>
    %c3_58 = arith.constant 3 : index
    %c0_59 = arith.constant 0 : index
    %c0_60 = arith.constant 0 : index
    %c0_61 = arith.constant 0 : index
    %c0_62 = arith.constant 0 : index
    %25 = vector.load %arg2[%c3_58, %c0_59, %c0_60, %c0_61, %c0_62] : memref<4x4x4x4x4xf32, #tpu.memory_space<vmem>>, vector<1x1x1x4x4xf32>
    %26 = vector.shape_cast %25 : vector<1x1x1x4x4xf32> to vector<4x4xf32>
    %c3_63 = arith.constant 3 : index
    %c0_64 = arith.constant 0 : index
    %c1_65 = arith.constant 1 : index
    %c0_66 = arith.constant 0 : index
    %c0_67 = arith.constant 0 : index
    %27 = vector.load %arg2[%c3_63, %c0_64, %c1_65, %c0_66, %c0_67] : memref<4x4x4x4x4xf32, #tpu.memory_space<vmem>>, vector<1x1x1x4x4xf32>
    %28 = vector.shape_cast %27 : vector<1x1x1x4x4xf32> to vector<4x4xf32>
    %c3_68 = arith.constant 3 : index
    %c0_69 = arith.constant 0 : index
    %c2_70 = arith.constant 2 : index
    %c0_71 = arith.constant 0 : index
    %c0_72 = arith.constant 0 : index
    %29 = vector.load %arg2[%c3_68, %c0_69, %c2_70, %c0_71, %c0_72] : memref<4x4x4x4x4xf32, #tpu.memory_space<vmem>>, vector<1x1x1x4x4xf32>
    %30 = vector.shape_cast %29 : vector<1x1x1x4x4xf32> to vector<4x4xf32>
    %c3_73 = arith.constant 3 : index
    %c0_74 = arith.constant 0 : index
    %c3_75 = arith.constant 3 : index
    %c0_76 = arith.constant 0 : index
    %c0_77 = arith.constant 0 : index
    %31 = vector.load %arg2[%c3_73, %c0_74, %c3_75, %c0_76, %c0_77] : memref<4x4x4x4x4xf32, #tpu.memory_space<vmem>>, vector<1x1x1x4x4xf32>
    %32 = vector.shape_cast %31 : vector<1x1x1x4x4xf32> to vector<4x4xf32>
    %cst = arith.constant 0.000000e+00 : f32
    %33 = vector.broadcast %cst : f32 to vector<4x64xf32>
    %34 = tpu.concatenate %2, %4, %6, %8, %10, %12, %14, %16, %18, %20, %22, %24, %26, %28, %30, %32 in 1 : vector<4x4xf32>, vector<4x4xf32>, vector<4x4xf32>, vector<4x4xf32>, vector<4x4xf32>, vector<4x4xf32>, vector<4x4xf32>, vector<4x4xf32>, vector<4x4xf32>, vector<4x4xf32>, vector<4x4xf32>, vector<4x4xf32>, vector<4x4xf32>, vector<4x4xf32>, vector<4x4xf32>, vector<4x4xf32> -> vector<4x64xf32>
    %35 = tpu.concatenate %34, %33 in 1 : vector<4x64xf32>, vector<4x64xf32> -> vector<4x128xf32>
    %cst_78 = arith.constant dense<0.000000e+00> : vector<4x32xf32>
    %36 = tpu.matmul %35, %0, %cst_78 {dimension_numbers = #tpu.dot_dimension_numbers<[1], [0], [0], [1], [0, 0, 1, 1], [], []>} : vector<4x128xf32>, vector<128x32xf32>, vector<4x32xf32> -> vector<4x32xf32>
    %c0_79 = arith.constant 0 : index
    %c0_80 = arith.constant 0 : index
    %c0_81 = arith.constant 0 : index
    %37 = vector.load %arg4[%c0_79, %c0_80, %c0_81] : memref<4x4x32xf32, #tpu.memory_space<vmem>>, vector<1x4x32xf32>
    %38 = vector.shape_cast %37 : vector<1x4x32xf32> to vector<4x32xf32>
    %39 = arith.addf %36, %38 : vector<4x32xf32>
    %c0_82 = arith.constant 0 : index
    %c0_83 = arith.constant 0 : index
    %c0_84 = arith.constant 0 : index
    %40 = vector.load %arg5[%c0_82, %c0_83, %c0_84] : memref<4x4x32xf32, #tpu.memory_space<vmem>>, vector<1x4x32xf32>
    %41 = vector.shape_cast %40 : vector<1x4x32xf32> to vector<4x32xf32>
    %42 = vector.shape_cast %39 : vector<4x32xf32> to vector<1x4x32xf32>
    tpu.vector_store %arg5[%c0_82, %c0_83, %c0_84], %42 {strides = array<i32>} : memref<4x4x32xf32, #tpu.memory_space<vmem>>, vector<1x4x32xf32>,
    %c0_85 = arith.constant 0 : index
    %c1_86 = arith.constant 1 : index
    %c0_87 = arith.constant 0 : index
    %c0_88 = arith.constant 0 : index
    %c0_89 = arith.constant 0 : index
    %43 = vector.load %arg2[%c0_85, %c1_86, %c0_87, %c0_88, %c0_89] : memref<4x4x4x4x4xf32, #tpu.memory_space<vmem>>, vector<1x1x1x4x4xf32>
    %44 = vector.shape_cast %43 : vector<1x1x1x4x4xf32> to vector<4x4xf32>
    %c0_90 = arith.constant 0 : index
    %c1_91 = arith.constant 1 : index
    %c1_92 = arith.constant 1 : index
    %c0_93 = arith.constant 0 : index
    %c0_94 = arith.constant 0 : index
    %45 = vector.load %arg2[%c0_90, %c1_91, %c1_92, %c0_93, %c0_94] : memref<4x4x4x4x4xf32, #tpu.memory_space<vmem>>, vector<1x1x1x4x4xf32>
    %46 = vector.shape_cast %45 : vector<1x1x1x4x4xf32> to vector<4x4xf32>
    %c0_95 = arith.constant 0 : index
    %c1_96 = arith.constant 1 : index
    %c2_97 = arith.constant 2 : index
    %c0_98 = arith.constant 0 : index
    %c0_99 = arith.constant 0 : index
    %47 = vector.load %arg2[%c0_95, %c1_96, %c2_97, %c0_98, %c0_99] : memref<4x4x4x4x4xf32, #tpu.memory_space<vmem>>, vector<1x1x1x4x4xf32>
    %48 = vector.shape_cast %47 : vector<1x1x1x4x4xf32> to vector<4x4xf32>
    %c0_100 = arith.constant 0 : index
    %c1_101 = arith.constant 1 : index
    %c3_102 = arith.constant 3 : index
    %c0_103 = arith.constant 0 : index
    %c0_104 = arith.constant 0 : index
    %49 = vector.load %arg2[%c0_100, %c1_101, %c3_102, %c0_103, %c0_104] : memref<4x4x4x4x4xf32, #tpu.memory_space<vmem>>, vector<1x1x1x4x4xf32>
    %50 = vector.shape_cast %49 : vector<1x1x1x4x4xf32> to vector<4x4xf32>
    %c1_105 = arith.constant 1 : index
    %c1_106 = arith.constant 1 : index
    %c0_107 = arith.constant 0 : index
    %c0_108 = arith.constant 0 : index
    %c0_109 = arith.constant 0 : index
    %51 = vector.load %arg2[%c1_105, %c1_106, %c0_107, %c0_108, %c0_109] : memref<4x4x4x4x4xf32, #tpu.memory_space<vmem>>, vector<1x1x1x4x4xf32>
    %52 = vector.shape_cast %51 : vector<1x1x1x4x4xf32> to vector<4x4xf32>
    %c1_110 = arith.constant 1 : index
    %c1_111 = arith.constant 1 : index
    %c1_112 = arith.constant 1 : index
    %c0_113 = arith.constant 0 : index
    %c0_114 = arith.constant 0 : index
    %53 = vector.load %arg2[%c1_110, %c1_111, %c1_112, %c0_113, %c0_114] : memref<4x4x4x4x4xf32, #tpu.memory_space<vmem>>, vector<1x1x1x4x4xf32>
    %54 = vector.shape_cast %53 : vector<1x1x1x4x4xf32> to vector<4x4xf32>
    %c1_115 = arith.constant 1 : index
    %c1_116 = arith.constant 1 : index
    %c2_117 = arith.constant 2 : index
    %c0_118 = arith.constant 0 : index
    %c0_119 = arith.constant 0 : index
    %55 = vector.load %arg2[%c1_115, %c1_116, %c2_117, %c0_118, %c0_119] : memref<4x4x4x4x4xf32, #tpu.memory_space<vmem>>, vector<1x1x1x4x4xf32>
    %56 = vector.shape_cast %55 : vector<1x1x1x4x4xf32> to vector<4x4xf32>
    %c1_120 = arith.constant 1 : index
    %c1_121 = arith.constant 1 : index
    %c3_122 = arith.constant 3 : index
    %c0_123 = arith.constant 0 : index
    %c0_124 = arith.constant 0 : index
    %57 = vector.load %arg2[%c1_120, %c1_121, %c3_122, %c0_123, %c0_124] : memref<4x4x4x4x4xf32, #tpu.memory_space<vmem>>, vector<1x1x1x4x4xf32>
    %58 = vector.shape_cast %57 : vector<1x1x1x4x4xf32> to vector<4x4xf32>
    %c2_125 = arith.constant 2 : index
    %c1_126 = arith.constant 1 : index
    %c0_127 = arith.constant 0 : index
    %c0_128 = arith.constant 0 : index
    %c0_129 = arith.constant 0 : index
    %59 = vector.load %arg2[%c2_125, %c1_126, %c0_127, %c0_128, %c0_129] : memref<4x4x4x4x4xf32, #tpu.memory_space<vmem>>, vector<1x1x1x4x4xf32>
    %60 = vector.shape_cast %59 : vector<1x1x1x4x4xf32> to vector<4x4xf32>
    %c2_130 = arith.constant 2 : index
    %c1_131 = arith.constant 1 : index
    %c1_132 = arith.constant 1 : index
    %c0_133 = arith.constant 0 : index
    %c0_134 = arith.constant 0 : index
    %61 = vector.load %arg2[%c2_130, %c1_131, %c1_132, %c0_133, %c0_134] : memref<4x4x4x4x4xf32, #tpu.memory_space<vmem>>, vector<1x1x1x4x4xf32>
    %62 = vector.shape_cast %61 : vector<1x1x1x4x4xf32> to vector<4x4xf32>
    %c2_135 = arith.constant 2 : index
    %c1_136 = arith.constant 1 : index
    %c2_137 = arith.constant 2 : index
    %c0_138 = arith.constant 0 : index
    %c0_139 = arith.constant 0 : index
    %63 = vector.load %arg2[%c2_135, %c1_136, %c2_137, %c0_138, %c0_139] : memref<4x4x4x4x4xf32, #tpu.memory_space<vmem>>, vector<1x1x1x4x4xf32>
    %64 = vector.shape_cast %63 : vector<1x1x1x4x4xf32> to vector<4x4xf32>
    %c2_140 = arith.constant 2 : index
    %c1_141 = arith.constant 1 : index
    %c3_142 = arith.constant 3 : index
    %c0_143 = arith.constant 0 : index
    %c0_144 = arith.constant 0 : index
    %65 = vector.load %arg2[%c2_140, %c1_141, %c3_142, %c0_143, %c0_144] : memref<4x4x4x4x4xf32, #tpu.memory_space<vmem>>, vector<1x1x1x4x4xf32>
    %66 = vector.shape_cast %65 : vector<1x1x1x4x4xf32> to vector<4x4xf32>
    %c3_145 = arith.constant 3 : index
    %c1_146 = arith.constant 1 : index
    %c0_147 = arith.constant 0 : index
    %c0_148 = arith.constant 0 : index
    %c0_149 = arith.constant 0 : index
    %67 = vector.load %arg2[%c3_145, %c1_146, %c0_147, %c0_148, %c0_149] : memref<4x4x4x4x4xf32, #tpu.memory_space<vmem>>, vector<1x1x1x4x4xf32>
    %68 = vector.shape_cast %67 : vector<1x1x1x4x4xf32> to vector<4x4xf32>
    %c3_150 = arith.constant 3 : index
    %c1_151 = arith.constant 1 : index
    %c1_152 = arith.constant 1 : index
    %c0_153 = arith.constant 0 : index
    %c0_154 = arith.constant 0 : index
    %69 = vector.load %arg2[%c3_150, %c1_151, %c1_152, %c0_153, %c0_154] : memref<4x4x4x4x4xf32, #tpu.memory_space<vmem>>, vector<1x1x1x4x4xf32>
    %70 = vector.shape_cast %69 : vector<1x1x1x4x4xf32> to vector<4x4xf32>
    %c3_155 = arith.constant 3 : index
    %c1_156 = arith.constant 1 : index
    %c2_157 = arith.constant 2 : index
    %c0_158 = arith.constant 0 : index
    %c0_159 = arith.constant 0 : index
    %71 = vector.load %arg2[%c3_155, %c1_156, %c2_157, %c0_158, %c0_159] : memref<4x4x4x4x4xf32, #tpu.memory_space<vmem>>, vector<1x1x1x4x4xf32>
    %72 = vector.shape_cast %71 : vector<1x1x1x4x4xf32> to vector<4x4xf32>
    %c3_160 = arith.constant 3 : index
    %c1_161 = arith.constant 1 : index
    %c3_162 = arith.constant 3 : index
    %c0_163 = arith.constant 0 : index
    %c0_164 = arith.constant 0 : index
    %73 = vector.load %arg2[%c3_160, %c1_161, %c3_162, %c0_163, %c0_164] : memref<4x4x4x4x4xf32, #tpu.memory_space<vmem>>, vector<1x1x1x4x4xf32>
    %74 = vector.shape_cast %73 : vector<1x1x1x4x4xf32> to vector<4x4xf32>
    %cst_165 = arith.constant 0.000000e+00 : f32
    %75 = vector.broadcast %cst_165 : f32 to vector<4x64xf32>
    %76 = tpu.concatenate %44, %46, %48, %50, %52, %54, %56, %58, %60, %62, %64, %66, %68, %70, %72, %74 in 1 : vector<4x4xf32>, vector<4x4xf32>, vector<4x4xf32>, vector<4x4xf32>, vector<4x4xf32>, vector<4x4xf32>, vector<4x4xf32>, vector<4x4xf32>, vector<4x4xf32>, vector<4x4xf32>, vector<4x4xf32>, vector<4x4xf32>, vector<4x4xf32>, vector<4x4xf32>, vector<4x4xf32>, vector<4x4xf32> -> vector<4x64xf32>
    %77 = tpu.concatenate %76, %75 in 1 : vector<4x64xf32>, vector<4x64xf32> -> vector<4x128xf32>
    %cst_166 = arith.constant dense<0.000000e+00> : vector<4x32xf32>
    %78 = tpu.matmul %77, %0, %cst_166 {dimension_numbers = #tpu.dot_dimension_numbers<[1], [0], [0], [1], [0, 0, 1, 1], [], []>} : vector<4x128xf32>, vector<128x32xf32>, vector<4x32xf32> -> vector<4x32xf32>
    %c1_167 = arith.constant 1 : index
    %c0_168 = arith.constant 0 : index
    %c0_169 = arith.constant 0 : index
    %79 = vector.load %arg4[%c1_167, %c0_168, %c0_169] : memref<4x4x32xf32, #tpu.memory_space<vmem>>, vector<1x4x32xf32>
    %80 = vector.shape_cast %79 : vector<1x4x32xf32> to vector<4x32xf32>
    %81 = arith.addf %78, %80 : vector<4x32xf32>
    %c1_170 = arith.constant 1 : index
    %c0_171 = arith.constant 0 : index
    %c0_172 = arith.constant 0 : index
    %82 = vector.load %arg5[%c1_170, %c0_171, %c0_172] : memref<4x4x32xf32, #tpu.memory_space<vmem>>, vector<1x4x32xf32>
    %83 = vector.shape_cast %82 : vector<1x4x32xf32> to vector<4x32xf32>
    %84 = vector.shape_cast %81 : vector<4x32xf32> to vector<1x4x32xf32>
    tpu.vector_store %arg5[%c1_170, %c0_171, %c0_172], %84 {strides = array<i32>} : memref<4x4x32xf32, #tpu.memory_space<vmem>>, vector<1x4x32xf32>,
    %c0_173 = arith.constant 0 : index
    %c2_174 = arith.constant 2 : index
    %c0_175 = arith.constant 0 : index
    %c0_176 = arith.constant 0 : index
    %c0_177 = arith.constant 0 : index
    %85 = vector.load %arg2[%c0_173, %c2_174, %c0_175, %c0_176, %c0_177] : memref<4x4x4x4x4xf32, #tpu.memory_space<vmem>>, vector<1x1x1x4x4xf32>
    %86 = vector.shape_cast %85 : vector<1x1x1x4x4xf32> to vector<4x4xf32>
    %c0_178 = arith.constant 0 : index
    %c2_179 = arith.constant 2 : index
    %c1_180 = arith.constant 1 : index
    %c0_181 = arith.constant 0 : index
    %c0_182 = arith.constant 0 : index
    %87 = vector.load %arg2[%c0_178, %c2_179, %c1_180, %c0_181, %c0_182] : memref<4x4x4x4x4xf32, #tpu.memory_space<vmem>>, vector<1x1x1x4x4xf32>
    %88 = vector.shape_cast %87 : vector<1x1x1x4x4xf32> to vector<4x4xf32>
    %c0_183 = arith.constant 0 : index
    %c2_184 = arith.constant 2 : index
    %c2_185 = arith.constant 2 : index
    %c0_186 = arith.constant 0 : index
    %c0_187 = arith.constant 0 : index
    %89 = vector.load %arg2[%c0_183, %c2_184, %c2_185, %c0_186, %c0_187] : memref<4x4x4x4x4xf32, #tpu.memory_space<vmem>>, vector<1x1x1x4x4xf32>
    %90 = vector.shape_cast %89 : vector<1x1x1x4x4xf32> to vector<4x4xf32>
    %c0_188 = arith.constant 0 : index
    %c2_189 = arith.constant 2 : index
    %c3_190 = arith.constant 3 : index
    %c0_191 = arith.constant 0 : index
    %c0_192 = arith.constant 0 : index
    %91 = vector.load %arg2[%c0_188, %c2_189, %c3_190, %c0_191, %c0_192] : memref<4x4x4x4x4xf32, #tpu.memory_space<vmem>>, vector<1x1x1x4x4xf32>
    %92 = vector.shape_cast %91 : vector<1x1x1x4x4xf32> to vector<4x4xf32>
    %c1_193 = arith.constant 1 : index
    %c2_194 = arith.constant 2 : index
    %c0_195 = arith.constant 0 : index
    %c0_196 = arith.constant 0 : index
    %c0_197 = arith.constant 0 : index
    %93 = vector.load %arg2[%c1_193, %c2_194, %c0_195, %c0_196, %c0_197] : memref<4x4x4x4x4xf32, #tpu.memory_space<vmem>>, vector<1x1x1x4x4xf32>
    %94 = vector.shape_cast %93 : vector<1x1x1x4x4xf32> to vector<4x4xf32>
    %c1_198 = arith.constant 1 : index
    %c2_199 = arith.constant 2 : index
    %c1_200 = arith.constant 1 : index
    %c0_201 = arith.constant 0 : index
    %c0_202 = arith.constant 0 : index
    %95 = vector.load %arg2[%c1_198, %c2_199, %c1_200, %c0_201, %c0_202] : memref<4x4x4x4x4xf32, #tpu.memory_space<vmem>>, vector<1x1x1x4x4xf32>
    %96 = vector.shape_cast %95 : vector<1x1x1x4x4xf32> to vector<4x4xf32>
    %c1_203 = arith.constant 1 : index
    %c2_204 = arith.constant 2 : index
    %c2_205 = arith.constant 2 : index
    %c0_206 = arith.constant 0 : index
    %c0_207 = arith.constant 0 : index
    %97 = vector.load %arg2[%c1_203, %c2_204, %c2_205, %c0_206, %c0_207] : memref<4x4x4x4x4xf32, #tpu.memory_space<vmem>>, vector<1x1x1x4x4xf32>
    %98 = vector.shape_cast %97 : vector<1x1x1x4x4xf32> to vector<4x4xf32>
    %c1_208 = arith.constant 1 : index
    %c2_209 = arith.constant 2 : index
    %c3_210 = arith.constant 3 : index
    %c0_211 = arith.constant 0 : index
    %c0_212 = arith.constant 0 : index
    %99 = vector.load %arg2[%c1_208, %c2_209, %c3_210, %c0_211, %c0_212] : memref<4x4x4x4x4xf32, #tpu.memory_space<vmem>>, vector<1x1x1x4x4xf32>
    %100 = vector.shape_cast %99 : vector<1x1x1x4x4xf32> to vector<4x4xf32>
    %c2_213 = arith.constant 2 : index
    %c2_214 = arith.constant 2 : index
    %c0_215 = arith.constant 0 : index
    %c0_216 = arith.constant 0 : index
    %c0_217 = arith.constant 0 : index
    %101 = vector.load %arg2[%c2_213, %c2_214, %c0_215, %c0_216, %c0_217] : memref<4x4x4x4x4xf32, #tpu.memory_space<vmem>>, vector<1x1x1x4x4xf32>
    %102 = vector.shape_cast %101 : vector<1x1x1x4x4xf32> to vector<4x4xf32>
    %c2_218 = arith.constant 2 : index
    %c2_219 = arith.constant 2 : index
    %c1_220 = arith.constant 1 : index
    %c0_221 = arith.constant 0 : index
    %c0_222 = arith.constant 0 : index
    %103 = vector.load %arg2[%c2_218, %c2_219, %c1_220, %c0_221, %c0_222] : memref<4x4x4x4x4xf32, #tpu.memory_space<vmem>>, vector<1x1x1x4x4xf32>
    %104 = vector.shape_cast %103 : vector<1x1x1x4x4xf32> to vector<4x4xf32>
    %c2_223 = arith.constant 2 : index
    %c2_224 = arith.constant 2 : index
    %c2_225 = arith.constant 2 : index
    %c0_226 = arith.constant 0 : index
    %c0_227 = arith.constant 0 : index
    %105 = vector.load %arg2[%c2_223, %c2_224, %c2_225, %c0_226, %c0_227] : memref<4x4x4x4x4xf32, #tpu.memory_space<vmem>>, vector<1x1x1x4x4xf32>
    %106 = vector.shape_cast %105 : vector<1x1x1x4x4xf32> to vector<4x4xf32>
    %c2_228 = arith.constant 2 : index
    %c2_229 = arith.constant 2 : index
    %c3_230 = arith.constant 3 : index
    %c0_231 = arith.constant 0 : index
    %c0_232 = arith.constant 0 : index
    %107 = vector.load %arg2[%c2_228, %c2_229, %c3_230, %c0_231, %c0_232] : memref<4x4x4x4x4xf32, #tpu.memory_space<vmem>>, vector<1x1x1x4x4xf32>
    %108 = vector.shape_cast %107 : vector<1x1x1x4x4xf32> to vector<4x4xf32>
    %c3_233 = arith.constant 3 : index
    %c2_234 = arith.constant 2 : index
    %c0_235 = arith.constant 0 : index
    %c0_236 = arith.constant 0 : index
    %c0_237 = arith.constant 0 : index
    %109 = vector.load %arg2[%c3_233, %c2_234, %c0_235, %c0_236, %c0_237] : memref<4x4x4x4x4xf32, #tpu.memory_space<vmem>>, vector<1x1x1x4x4xf32>
    %110 = vector.shape_cast %109 : vector<1x1x1x4x4xf32> to vector<4x4xf32>
    %c3_238 = arith.constant 3 : index
    %c2_239 = arith.constant 2 : index
    %c1_240 = arith.constant 1 : index
    %c0_241 = arith.constant 0 : index
    %c0_242 = arith.constant 0 : index
    %111 = vector.load %arg2[%c3_238, %c2_239, %c1_240, %c0_241, %c0_242] : memref<4x4x4x4x4xf32, #tpu.memory_space<vmem>>, vector<1x1x1x4x4xf32>
    %112 = vector.shape_cast %111 : vector<1x1x1x4x4xf32> to vector<4x4xf32>
    %c3_243 = arith.constant 3 : index
    %c2_244 = arith.constant 2 : index
    %c2_245 = arith.constant 2 : index
    %c0_246 = arith.constant 0 : index
    %c0_247 = arith.constant 0 : index
    %113 = vector.load %arg2[%c3_243, %c2_244, %c2_245, %c0_246, %c0_247] : memref<4x4x4x4x4xf32, #tpu.memory_space<vmem>>, vector<1x1x1x4x4xf32>
    %114 = vector.shape_cast %113 : vector<1x1x1x4x4xf32> to vector<4x4xf32>
    %c3_248 = arith.constant 3 : index
    %c2_249 = arith.constant 2 : index
    %c3_250 = arith.constant 3 : index
    %c0_251 = arith.constant 0 : index
    %c0_252 = arith.constant 0 : index
    %115 = vector.load %arg2[%c3_248, %c2_249, %c3_250, %c0_251, %c0_252] : memref<4x4x4x4x4xf32, #tpu.memory_space<vmem>>, vector<1x1x1x4x4xf32>
    %116 = vector.shape_cast %115 : vector<1x1x1x4x4xf32> to vector<4x4xf32>
    %cst_253 = arith.constant 0.000000e+00 : f32
    %117 = vector.broadcast %cst_253 : f32 to vector<4x64xf32>
    %118 = tpu.concatenate %86, %88, %90, %92, %94, %96, %98, %100, %102, %104, %106, %108, %110, %112, %114, %116 in 1 : vector<4x4xf32>, vector<4x4xf32>, vector<4x4xf32>, vector<4x4xf32>, vector<4x4xf32>, vector<4x4xf32>, vector<4x4xf32>, vector<4x4xf32>, vector<4x4xf32>, vector<4x4xf32>, vector<4x4xf32>, vector<4x4xf32>, vector<4x4xf32>, vector<4x4xf32>, vector<4x4xf32>, vector<4x4xf32> -> vector<4x64xf32>
    %119 = tpu.concatenate %118, %117 in 1 : vector<4x64xf32>, vector<4x64xf32> -> vector<4x128xf32>
    %cst_254 = arith.constant dense<0.000000e+00> : vector<4x32xf32>
    %120 = tpu.matmul %119, %0, %cst_254 {dimension_numbers = #tpu.dot_dimension_numbers<[1], [0], [0], [1], [0, 0, 1, 1], [], []>} : vector<4x128xf32>, vector<128x32xf32>, vector<4x32xf32> -> vector<4x32xf32>
    %c2_255 = arith.constant 2 : index
    %c0_256 = arith.constant 0 : index
    %c0_257 = arith.constant 0 : index
    %121 = vector.load %arg4[%c2_255, %c0_256, %c0_257] : memref<4x4x32xf32, #tpu.memory_space<vmem>>, vector<1x4x32xf32>
    %122 = vector.shape_cast %121 : vector<1x4x32xf32> to vector<4x32xf32>
    %123 = arith.addf %120, %122 : vector<4x32xf32>
    %c2_258 = arith.constant 2 : index
    %c0_259 = arith.constant 0 : index
    %c0_260 = arith.constant 0 : index
    %124 = vector.load %arg5[%c2_258, %c0_259, %c0_260] : memref<4x4x32xf32, #tpu.memory_space<vmem>>, vector<1x4x32xf32>
    %125 = vector.shape_cast %124 : vector<1x4x32xf32> to vector<4x32xf32>
    %126 = vector.shape_cast %123 : vector<4x32xf32> to vector<1x4x32xf32>
    tpu.vector_store %arg5[%c2_258, %c0_259, %c0_260], %126 {strides = array<i32>} : memref<4x4x32xf32, #tpu.memory_space<vmem>>, vector<1x4x32xf32>,
    %c0_261 = arith.constant 0 : index
    %c3_262 = arith.constant 3 : index
    %c0_263 = arith.constant 0 : index
    %c0_264 = arith.constant 0 : index
    %c0_265 = arith.constant 0 : index
    %127 = vector.load %arg2[%c0_261, %c3_262, %c0_263, %c0_264, %c0_265] : memref<4x4x4x4x4xf32, #tpu.memory_space<vmem>>, vector<1x1x1x4x4xf32>
    %128 = vector.shape_cast %127 : vector<1x1x1x4x4xf32> to vector<4x4xf32>
    %c0_266 = arith.constant 0 : index
    %c3_267 = arith.constant 3 : index
    %c1_268 = arith.constant 1 : index
    %c0_269 = arith.constant 0 : index
    %c0_270 = arith.constant 0 : index
    %129 = vector.load %arg2[%c0_266, %c3_267, %c1_268, %c0_269, %c0_270] : memref<4x4x4x4x4xf32, #tpu.memory_space<vmem>>, vector<1x1x1x4x4xf32>
    %130 = vector.shape_cast %129 : vector<1x1x1x4x4xf32> to vector<4x4xf32>
    %c0_271 = arith.constant 0 : index
    %c3_272 = arith.constant 3 : index
    %c2_273 = arith.constant 2 : index
    %c0_274 = arith.constant 0 : index
    %c0_275 = arith.constant 0 : index
    %131 = vector.load %arg2[%c0_271, %c3_272, %c2_273, %c0_274, %c0_275] : memref<4x4x4x4x4xf32, #tpu.memory_space<vmem>>, vector<1x1x1x4x4xf32>
    %132 = vector.shape_cast %131 : vector<1x1x1x4x4xf32> to vector<4x4xf32>
    %c0_276 = arith.constant 0 : index
    %c3_277 = arith.constant 3 : index
    %c3_278 = arith.constant 3 : index
    %c0_279 = arith.constant 0 : index
    %c0_280 = arith.constant 0 : index
    %133 = vector.load %arg2[%c0_276, %c3_277, %c3_278, %c0_279, %c0_280] : memref<4x4x4x4x4xf32, #tpu.memory_space<vmem>>, vector<1x1x1x4x4xf32>
    %134 = vector.shape_cast %133 : vector<1x1x1x4x4xf32> to vector<4x4xf32>
    %c1_281 = arith.constant 1 : index
    %c3_282 = arith.constant 3 : index
    %c0_283 = arith.constant 0 : index
    %c0_284 = arith.constant 0 : index
    %c0_285 = arith.constant 0 : index
    %135 = vector.load %arg2[%c1_281, %c3_282, %c0_283, %c0_284, %c0_285] : memref<4x4x4x4x4xf32, #tpu.memory_space<vmem>>, vector<1x1x1x4x4xf32>
    %136 = vector.shape_cast %135 : vector<1x1x1x4x4xf32> to vector<4x4xf32>
    %c1_286 = arith.constant 1 : index
    %c3_287 = arith.constant 3 : index
    %c1_288 = arith.constant 1 : index
    %c0_289 = arith.constant 0 : index
    %c0_290 = arith.constant 0 : index
    %137 = vector.load %arg2[%c1_286, %c3_287, %c1_288, %c0_289, %c0_290] : memref<4x4x4x4x4xf32, #tpu.memory_space<vmem>>, vector<1x1x1x4x4xf32>
    %138 = vector.shape_cast %137 : vector<1x1x1x4x4xf32> to vector<4x4xf32>
    %c1_291 = arith.constant 1 : index
    %c3_292 = arith.constant 3 : index
    %c2_293 = arith.constant 2 : index
    %c0_294 = arith.constant 0 : index
    %c0_295 = arith.constant 0 : index
    %139 = vector.load %arg2[%c1_291, %c3_292, %c2_293, %c0_294, %c0_295] : memref<4x4x4x4x4xf32, #tpu.memory_space<vmem>>, vector<1x1x1x4x4xf32>
    %140 = vector.shape_cast %139 : vector<1x1x1x4x4xf32> to vector<4x4xf32>
    %c1_296 = arith.constant 1 : index
    %c3_297 = arith.constant 3 : index
    %c3_298 = arith.constant 3 : index
    %c0_299 = arith.constant 0 : index
    %c0_300 = arith.constant 0 : index
    %141 = vector.load %arg2[%c1_296, %c3_297, %c3_298, %c0_299, %c0_300] : memref<4x4x4x4x4xf32, #tpu.memory_space<vmem>>, vector<1x1x1x4x4xf32>
    %142 = vector.shape_cast %141 : vector<1x1x1x4x4xf32> to vector<4x4xf32>
    %c2_301 = arith.constant 2 : index
    %c3_302 = arith.constant 3 : index
    %c0_303 = arith.constant 0 : index
    %c0_304 = arith.constant 0 : index
    %c0_305 = arith.constant 0 : index
    %143 = vector.load %arg2[%c2_301, %c3_302, %c0_303, %c0_304, %c0_305] : memref<4x4x4x4x4xf32, #tpu.memory_space<vmem>>, vector<1x1x1x4x4xf32>
    %144 = vector.shape_cast %143 : vector<1x1x1x4x4xf32> to vector<4x4xf32>
    %c2_306 = arith.constant 2 : index
    %c3_307 = arith.constant 3 : index
    %c1_308 = arith.constant 1 : index
    %c0_309 = arith.constant 0 : index
    %c0_310 = arith.constant 0 : index
    %145 = vector.load %arg2[%c2_306, %c3_307, %c1_308, %c0_309, %c0_310] : memref<4x4x4x4x4xf32, #tpu.memory_space<vmem>>, vector<1x1x1x4x4xf32>
    %146 = vector.shape_cast %145 : vector<1x1x1x4x4xf32> to vector<4x4xf32>
    %c2_311 = arith.constant 2 : index
    %c3_312 = arith.constant 3 : index
    %c2_313 = arith.constant 2 : index
    %c0_314 = arith.constant 0 : index
    %c0_315 = arith.constant 0 : index
    %147 = vector.load %arg2[%c2_311, %c3_312, %c2_313, %c0_314, %c0_315] : memref<4x4x4x4x4xf32, #tpu.memory_space<vmem>>, vector<1x1x1x4x4xf32>
    %148 = vector.shape_cast %147 : vector<1x1x1x4x4xf32> to vector<4x4xf32>
    %c2_316 = arith.constant 2 : index
    %c3_317 = arith.constant 3 : index
    %c3_318 = arith.constant 3 : index
    %c0_319 = arith.constant 0 : index
    %c0_320 = arith.constant 0 : index
    %149 = vector.load %arg2[%c2_316, %c3_317, %c3_318, %c0_319, %c0_320] : memref<4x4x4x4x4xf32, #tpu.memory_space<vmem>>, vector<1x1x1x4x4xf32>
    %150 = vector.shape_cast %149 : vector<1x1x1x4x4xf32> to vector<4x4xf32>
    %c3_321 = arith.constant 3 : index
    %c3_322 = arith.constant 3 : index
    %c0_323 = arith.constant 0 : index
    %c0_324 = arith.constant 0 : index
    %c0_325 = arith.constant 0 : index
    %151 = vector.load %arg2[%c3_321, %c3_322, %c0_323, %c0_324, %c0_325] : memref<4x4x4x4x4xf32, #tpu.memory_space<vmem>>, vector<1x1x1x4x4xf32>
    %152 = vector.shape_cast %151 : vector<1x1x1x4x4xf32> to vector<4x4xf32>
    %c3_326 = arith.constant 3 : index
    %c3_327 = arith.constant 3 : index
    %c1_328 = arith.constant 1 : index
    %c0_329 = arith.constant 0 : index
    %c0_330 = arith.constant 0 : index
    %153 = vector.load %arg2[%c3_326, %c3_327, %c1_328, %c0_329, %c0_330] : memref<4x4x4x4x4xf32, #tpu.memory_space<vmem>>, vector<1x1x1x4x4xf32>
    %154 = vector.shape_cast %153 : vector<1x1x1x4x4xf32> to vector<4x4xf32>
    %c3_331 = arith.constant 3 : index
    %c3_332 = arith.constant 3 : index
    %c2_333 = arith.constant 2 : index
    %c0_334 = arith.constant 0 : index
    %c0_335 = arith.constant 0 : index
    %155 = vector.load %arg2[%c3_331, %c3_332, %c2_333, %c0_334, %c0_335] : memref<4x4x4x4x4xf32, #tpu.memory_space<vmem>>, vector<1x1x1x4x4xf32>
    %156 = vector.shape_cast %155 : vector<1x1x1x4x4xf32> to vector<4x4xf32>
    %c3_336 = arith.constant 3 : index
    %c3_337 = arith.constant 3 : index
    %c3_338 = arith.constant 3 : index
    %c0_339 = arith.constant 0 : index
    %c0_340 = arith.constant 0 : index
    %157 = vector.load %arg2[%c3_336, %c3_337, %c3_338, %c0_339, %c0_340] : memref<4x4x4x4x4xf32, #tpu.memory_space<vmem>>, vector<1x1x1x4x4xf32>
    %158 = vector.shape_cast %157 : vector<1x1x1x4x4xf32> to vector<4x4xf32>
    %cst_341 = arith.constant 0.000000e+00 : f32
    %159 = vector.broadcast %cst_341 : f32 to vector<4x64xf32>
    %160 = tpu.concatenate %128, %130, %132, %134, %136, %138, %140, %142, %144, %146, %148, %150, %152, %154, %156, %158 in 1 : vector<4x4xf32>, vector<4x4xf32>, vector<4x4xf32>, vector<4x4xf32>, vector<4x4xf32>, vector<4x4xf32>, vector<4x4xf32>, vector<4x4xf32>, vector<4x4xf32>, vector<4x4xf32>, vector<4x4xf32>, vector<4x4xf32>, vector<4x4xf32>, vector<4x4xf32>, vector<4x4xf32>, vector<4x4xf32> -> vector<4x64xf32>
    %161 = tpu.concatenate %160, %159 in 1 : vector<4x64xf32>, vector<4x64xf32> -> vector<4x128xf32>
    %cst_342 = arith.constant dense<0.000000e+00> : vector<4x32xf32>
    %162 = tpu.matmul %161, %0, %cst_342 {dimension_numbers = #tpu.dot_dimension_numbers<[1], [0], [0], [1], [0, 0, 1, 1], [], []>} : vector<4x128xf32>, vector<128x32xf32>, vector<4x32xf32> -> vector<4x32xf32>
    %c3_343 = arith.constant 3 : index
    %c0_344 = arith.constant 0 : index
    %c0_345 = arith.constant 0 : index
    %163 = vector.load %arg4[%c3_343, %c0_344, %c0_345] : memref<4x4x32xf32, #tpu.memory_space<vmem>>, vector<1x4x32xf32>
    %164 = vector.shape_cast %163 : vector<1x4x32xf32> to vector<4x32xf32>
    %165 = arith.addf %162, %164 : vector<4x32xf32>
    %c3_346 = arith.constant 3 : index
    %c0_347 = arith.constant 0 : index
    %c0_348 = arith.constant 0 : index
    %166 = vector.load %arg5[%c3_346, %c0_347, %c0_348] : memref<4x4x32xf32, #tpu.memory_space<vmem>>, vector<1x4x32xf32>
    %167 = vector.shape_cast %166 : vector<1x4x32xf32> to vector<4x32xf32>
    %168 = vector.shape_cast %165 : vector<4x32xf32> to vector<1x4x32xf32>
    tpu.vector_store %arg5[%c3_346, %c0_347, %c0_348], %168 {strides = array<i32>} : memref<4x4x32xf32, #tpu.memory_space<vmem>>, vector<1x4x32xf32>,
    return
  }
  func.func @transform_0(%arg0: i32, %arg1: i32) -> (i32, i32, i32, i32, i32) {
    %c0_i32 = arith.constant 0 : i32
    %c0_i32_0 = arith.constant 0 : i32
    %c0_i32_1 = arith.constant 0 : i32
    %c0_i32_2 = arith.constant 0 : i32
    return %arg0, %arg1, %c0_i32, %c0_i32_0, %c0_i32_1 : i32, i32, i32, i32, i32
  }
  func.func @transform_1(%arg0: i32, %arg1: i32) -> (i32, i32) {
    %c0_i32 = arith.constant 0 : i32
    %c0_i32_0 = arith.constant 0 : i32
    %c0_i32_1 = arith.constant 0 : i32
    return %c0_i32, %c0_i32_0 : i32, i32
  }
  func.func @transform_2(%arg0: i32, %arg1: i32) -> (i32, i32, i32) {
    %c0_i32 = arith.constant 0 : i32
    %c0_i32_0 = arith.constant 0 : i32
    %c0_i32_1 = arith.constant 0 : i32
    return %arg1, %c0_i32, %c0_i32_0 : i32, i32, i32
  }
  func.func @transform_3(%arg0: i32, %arg1: i32) -> (i32, i32, i32) {
    %c1_i32 = arith.constant 1 : i32
    %0 = arith.muli %arg0, %c1_i32 : i32
    %1 = arith.addi %0, %arg1 : i32
    %c0_i32 = arith.constant 0 : i32
    %c0_i32_0 = arith.constant 0 : i32
    %c0_i32_1 = arith.constant 0 : i32
    return %1, %c0_i32, %c0_i32_0 : i32, i32, i32
  }
}

module attributes {stable_mosaic.version = 11 : i64} {
  func.func @kernel(%arg0: i32, %arg1: i32, %arg2: memref<4x4x128xf32, #tpu.memory_space<vmem>>, %arg3: memref<128x32xf32, #tpu.memory_space<vmem>>, %arg4: memref<4x4x32xf32, #tpu.memory_space<vmem>>, %arg5: memref<4x4x32xf32, #tpu.memory_space<vmem>>) attributes {dimension_semantics = [#tpu.dimension_semantics<parallel>, #tpu.dimension_semantics<parallel>], iteration_bounds = array<i64: 2, 1>, scalar_prefetch = 0 : i64, scratch_operands = 0 : i64, tpu.core_type = #tpu.core_type<tc>, window_params = [{transform_indices = @transform_0, window_bounds = array<i64: 4, 4, 128>}, {pipeline_mode = #tpu.pipeline_mode<synchronous>, transform_indices = @transform_1, window_bounds = array<i64: 128, 32>}, {transform_indices = @transform_2, window_bounds = array<i64: 4, 4, 32>}, {transform_indices = @transform_3, window_bounds = array<i64: 4, 4, 32>}]} {
    %c0 = arith.constant 0 : index
    %c0_0 = arith.constant 0 : index
    %0 = vector.load %arg3[%c0, %c0_0] : memref<128x32xf32, #tpu.memory_space<vmem>>, vector<128x32xf32>
    %c0_1 = arith.constant 0 : index
    %c0_2 = arith.constant 0 : index
    %c0_3 = arith.constant 0 : index
    %1 = vector.load %arg2[%c0_1, %c0_2, %c0_3] : memref<4x4x128xf32, #tpu.memory_space<vmem>>, vector<1x4x128xf32>
    %2 = vector.shape_cast %1 : vector<1x4x128xf32> to vector<4x128xf32>
    %cst = arith.constant dense<0.000000e+00> : vector<4x32xf32>
    %3 = tpu.matmul %2, %0, %cst {dimension_numbers = #tpu.dot_dimension_numbers<[1], [0], [0], [1], [0, 0, 1, 1], [], []>} : vector<4x128xf32>, vector<128x32xf32>, vector<4x32xf32> -> vector<4x32xf32>
    %c0_4 = arith.constant 0 : index
    %c0_5 = arith.constant 0 : index
    %c0_6 = arith.constant 0 : index
    %4 = vector.load %arg4[%c0_4, %c0_5, %c0_6] : memref<4x4x32xf32, #tpu.memory_space<vmem>>, vector<1x4x32xf32>
    %5 = vector.shape_cast %4 : vector<1x4x32xf32> to vector<4x32xf32>
    %6 = arith.addf %3, %5 : vector<4x32xf32>
    %c0_7 = arith.constant 0 : index
    %c0_8 = arith.constant 0 : index
    %c0_9 = arith.constant 0 : index
    %7 = vector.load %arg5[%c0_7, %c0_8, %c0_9] : memref<4x4x32xf32, #tpu.memory_space<vmem>>, vector<1x4x32xf32>
    %8 = vector.shape_cast %7 : vector<1x4x32xf32> to vector<4x32xf32>
    %9 = vector.shape_cast %6 : vector<4x32xf32> to vector<1x4x32xf32>
    tpu.vector_store %arg5[%c0_7, %c0_8, %c0_9], %9 {strides = array<i32>} : memref<4x4x32xf32, #tpu.memory_space<vmem>>, vector<1x4x32xf32>,
    %c1 = arith.constant 1 : index
    %c0_10 = arith.constant 0 : index
    %c0_11 = arith.constant 0 : index
    %10 = vector.load %arg2[%c1, %c0_10, %c0_11] : memref<4x4x128xf32, #tpu.memory_space<vmem>>, vector<1x4x128xf32>
    %11 = vector.shape_cast %10 : vector<1x4x128xf32> to vector<4x128xf32>
    %cst_12 = arith.constant dense<0.000000e+00> : vector<4x32xf32>
    %12 = tpu.matmul %11, %0, %cst_12 {dimension_numbers = #tpu.dot_dimension_numbers<[1], [0], [0], [1], [0, 0, 1, 1], [], []>} : vector<4x128xf32>, vector<128x32xf32>, vector<4x32xf32> -> vector<4x32xf32>
    %c1_13 = arith.constant 1 : index
    %c0_14 = arith.constant 0 : index
    %c0_15 = arith.constant 0 : index
    %13 = vector.load %arg4[%c1_13, %c0_14, %c0_15] : memref<4x4x32xf32, #tpu.memory_space<vmem>>, vector<1x4x32xf32>
    %14 = vector.shape_cast %13 : vector<1x4x32xf32> to vector<4x32xf32>
    %15 = arith.addf %12, %14 : vector<4x32xf32>
    %c1_16 = arith.constant 1 : index
    %c0_17 = arith.constant 0 : index
    %c0_18 = arith.constant 0 : index
    %16 = vector.load %arg5[%c1_16, %c0_17, %c0_18] : memref<4x4x32xf32, #tpu.memory_space<vmem>>, vector<1x4x32xf32>
    %17 = vector.shape_cast %16 : vector<1x4x32xf32> to vector<4x32xf32>
    %18 = vector.shape_cast %15 : vector<4x32xf32> to vector<1x4x32xf32>
    tpu.vector_store %arg5[%c1_16, %c0_17, %c0_18], %18 {strides = array<i32>} : memref<4x4x32xf32, #tpu.memory_space<vmem>>, vector<1x4x32xf32>,
    %c2 = arith.constant 2 : index
    %c0_19 = arith.constant 0 : index
    %c0_20 = arith.constant 0 : index
    %19 = vector.load %arg2[%c2, %c0_19, %c0_20] : memref<4x4x128xf32, #tpu.memory_space<vmem>>, vector<1x4x128xf32>
    %20 = vector.shape_cast %19 : vector<1x4x128xf32> to vector<4x128xf32>
    %cst_21 = arith.constant dense<0.000000e+00> : vector<4x32xf32>
    %21 = tpu.matmul %20, %0, %cst_21 {dimension_numbers = #tpu.dot_dimension_numbers<[1], [0], [0], [1], [0, 0, 1, 1], [], []>} : vector<4x128xf32>, vector<128x32xf32>, vector<4x32xf32> -> vector<4x32xf32>
    %c2_22 = arith.constant 2 : index
    %c0_23 = arith.constant 0 : index
    %c0_24 = arith.constant 0 : index
    %22 = vector.load %arg4[%c2_22, %c0_23, %c0_24] : memref<4x4x32xf32, #tpu.memory_space<vmem>>, vector<1x4x32xf32>
    %23 = vector.shape_cast %22 : vector<1x4x32xf32> to vector<4x32xf32>
    %24 = arith.addf %21, %23 : vector<4x32xf32>
    %c2_25 = arith.constant 2 : index
    %c0_26 = arith.constant 0 : index
    %c0_27 = arith.constant 0 : index
    %25 = vector.load %arg5[%c2_25, %c0_26, %c0_27] : memref<4x4x32xf32, #tpu.memory_space<vmem>>, vector<1x4x32xf32>
    %26 = vector.shape_cast %25 : vector<1x4x32xf32> to vector<4x32xf32>
    %27 = vector.shape_cast %24 : vector<4x32xf32> to vector<1x4x32xf32>
    tpu.vector_store %arg5[%c2_25, %c0_26, %c0_27], %27 {strides = array<i32>} : memref<4x4x32xf32, #tpu.memory_space<vmem>>, vector<1x4x32xf32>,
    %c3 = arith.constant 3 : index
    %c0_28 = arith.constant 0 : index
    %c0_29 = arith.constant 0 : index
    %28 = vector.load %arg2[%c3, %c0_28, %c0_29] : memref<4x4x128xf32, #tpu.memory_space<vmem>>, vector<1x4x128xf32>
    %29 = vector.shape_cast %28 : vector<1x4x128xf32> to vector<4x128xf32>
    %cst_30 = arith.constant dense<0.000000e+00> : vector<4x32xf32>
    %30 = tpu.matmul %29, %0, %cst_30 {dimension_numbers = #tpu.dot_dimension_numbers<[1], [0], [0], [1], [0, 0, 1, 1], [], []>} : vector<4x128xf32>, vector<128x32xf32>, vector<4x32xf32> -> vector<4x32xf32>
    %c3_31 = arith.constant 3 : index
    %c0_32 = arith.constant 0 : index
    %c0_33 = arith.constant 0 : index
    %31 = vector.load %arg4[%c3_31, %c0_32, %c0_33] : memref<4x4x32xf32, #tpu.memory_space<vmem>>, vector<1x4x32xf32>
    %32 = vector.shape_cast %31 : vector<1x4x32xf32> to vector<4x32xf32>
    %33 = arith.addf %30, %32 : vector<4x32xf32>
    %c3_34 = arith.constant 3 : index
    %c0_35 = arith.constant 0 : index
    %c0_36 = arith.constant 0 : index
    %34 = vector.load %arg5[%c3_34, %c0_35, %c0_36] : memref<4x4x32xf32, #tpu.memory_space<vmem>>, vector<1x4x32xf32>
    %35 = vector.shape_cast %34 : vector<1x4x32xf32> to vector<4x32xf32>
    %36 = vector.shape_cast %33 : vector<4x32xf32> to vector<1x4x32xf32>
    tpu.vector_store %arg5[%c3_34, %c0_35, %c0_36], %36 {strides = array<i32>} : memref<4x4x32xf32, #tpu.memory_space<vmem>>, vector<1x4x32xf32>,
    return
  }
  func.func @transform_0(%arg0: i32, %arg1: i32) -> (i32, i32, i32) {
    %c1_i32 = arith.constant 1 : i32
    %0 = arith.muli %arg0, %c1_i32 : i32
    %1 = arith.addi %0, %arg1 : i32
    %c0_i32 = arith.constant 0 : i32
    %c0_i32_0 = arith.constant 0 : i32
    %c0_i32_1 = arith.constant 0 : i32
    return %1, %c0_i32, %c0_i32_0 : i32, i32, i32
  }
  func.func @transform_1(%arg0: i32, %arg1: i32) -> (i32, i32) {
    %c0_i32 = arith.constant 0 : i32
    %c0_i32_0 = arith.constant 0 : i32
    %c0_i32_1 = arith.constant 0 : i32
    return %c0_i32, %c0_i32_0 : i32, i32
  }
  func.func @transform_2(%arg0: i32, %arg1: i32) -> (i32, i32, i32) {
    %c0_i32 = arith.constant 0 : i32
    %c0_i32_0 = arith.constant 0 : i32
    %c0_i32_1 = arith.constant 0 : i32
    return %arg1, %c0_i32, %c0_i32_0 : i32, i32, i32
  }
  func.func @transform_3(%arg0: i32, %arg1: i32) -> (i32, i32, i32) {
    %c1_i32 = arith.constant 1 : i32
    %0 = arith.muli %arg0, %c1_i32 : i32
    %1 = arith.addi %0, %arg1 : i32
    %c0_i32 = arith.constant 0 : i32
    %c0_i32_0 = arith.constant 0 : i32
    %c0_i32_1 = arith.constant 0 : i32
    return %1, %c0_i32, %c0_i32_0 : i32, i32, i32
  }
}

</mosaic_0001>

<bundles_post_ra>
// kernel: tpu_custom_call.1
= control target key start
LH: loop header
LB: loop body
LE: loop exit
PB: predicated region body
PF: predicated region fallthrough
CT: control target
= control target key end

     0   :  { %8 = vsyncpa [#allocation3], 0  ;;  %s1553_s0 = inlined_call_operand.vmem [shape: f32[8,4,4,4,4], index: 0, kind: input, shape index: {}]   ;;  %s1554_s1 = inlined_call_operand.vmem [shape: f32[128,32], index: 1, kind: input, shape index: {}]   ;;  %s1555_s2 = inlined_call_operand.vmem [shape: f32[4,4,32], index: 2, kind: input, shape index: {}]   ;;  %s1556_s3 = inlined_call_operand.hbm [shape: f32[8,4,32], index: 3, kind: output, shape index: {}]  }
   0x1   :  { %10 = vsyncpa [#allocation3 + $0x1], 0  ;;  %s1178_s12 = smov 0   ;;  %s1180_s13 = smov 0  }
   0x2   :  { %s1182_s14 = smov 0   ;;  %s1184_s15 = smov 0  }
   0x3   :  { %s1186_s16 = smov 0   ;;  %s1188_s17 = smov 0  }
   0x4 LB: > { %s901_s18 = sadd.s32 4294967295, %s1140_s17   ;;  %s902_s19 = sadd.s32 4294967294, %s1140_s17   ;;  %s1140_s17 = sphi %s1188_s17, %s16_s17   ;;  %s1136_s16 = sphi %s1186_s16, %s1563_s16   ;;  %s1132_s15 = sphi %s1184_s15, %s1562_s15   ;;  %s1128_s14 = sphi %s1182_s14, %s1561_s14   ;;  %s1124_s13 = sphi %s1180_s13, %s1560_s13   ;;  %s1120_s12 = sphi %s1178_s12, %s1559_s12  }
   0x5   : > { %s28_s20 = sadd.s32 1, %s1136_s16  ;;  %s112_s21 = sadd.s32 1, %s1128_s14 }
   0x6   : > { %p30_p0 = scmp.ge.s32.totalorder %s28_s20, 2  ;;  %p122_p1 = scmp.ne.s32.totalorder %s1128_s14, %s1124_s13 }
   0x7   : > { %p123_p2 = scmp.eq.s32.totalorder %s901_s18, 1  ;;  %p128_p3 = scmp.ne.s32.totalorder %s1124_s13, %s1120_s12 }
   0x8   : > { %s1565_s20 = smov (%p30_p0, %s28_s20), 0  ;;  %p129_p5 = scmp.eq.s32.totalorder %s902_s19, 1 }
   0x9   : > { %p1218_p4 = por %p123_p2, %p122_p1  ;;  %s109_s23 = ssub.s32 %s1136_s16, %s1565_s20 }
   0xa   : > { %p906_p6 = scmp.ge.s32.totalorder %s1140_s17, 1  ;;  %p110_p7 = scmp.eq.s32.totalorder %s109_s23, 0 }
   0xb   : > { %p1225_p8 = por %p129_p5, %p128_p3  ;;  %p175_p9 = scmp.lt.s32.totalorder %s1140_s17, 3 }
   0xc   : > { %s1231_s25 = scalar_select %p110_p7, %s1128_s14, %s112_s21  }
   0xd   : > { %p176_p10 = pnand %p906_p6, %p175_p9 }
   0xe   : > { %s908_s26 = sshll.u32 (!%p176_p10), %s1132_s15, 2  ;;  %s1142_s4 = smov (!%p176_p10), 8  }
   0xf   : > { %179 = sbr.rel (%p176_p10) target bundleno = 425 (0x1a9), region = 32  ;;  %p212_p11 = scmp.lt.s32.totalorder (!%p176_p10), %s908_s26, 7 }
  0x10   : > { %s1143_s5 = smov (!%p176_p10), 4   ;;  %s1144_s6 = smov (!%p176_p10), 12  }
  0x11   : > { %s1145_s7 = smov (!%p176_p10), 16   ;;  %s1146_s8 = smov (!%p176_p10), 20  }
  0x12   : > { %s1147_s9 = smov (!%p176_p10), 24   ;;  %s1148_s10 = smov (!%p176_p10), 28  }
  0x13   : > { %s1149_s11 = smov (!%p176_p10), 32   ;;  %s1150_s18 = smov (!%p176_p10), 36  }
  0x14   : > { %s1567_s26 = smov (!%p212_p11, %s908_s26), 7  ;;  %s1151_s19 = smov 40   ;;  %vm338_vm0 = vcmask 31744   ;;  %vm340_vm1 = vcmask 64512   ;;  %vm342_vm2 = vcmask 97280   ;;  %vm344_vm3 = vcmask 130048  }
  0x15   : > { %s989_s27 = sshll.u32 %s1567_s26, 6  ;;  %s1152_s21 = smov 44   ;;  %vm346_vm4 = vcmask 162816   ;;  %vm348_vm5 = vcmask 195584   ;;  %vm350_vm6 = vcmask 228352   ;;  %vm352_vm7 = vcmask 261120  }
  0x16   : > { %s1237_s30 = scalar_lea.vmem %s1553_s0, %s989_s27  ;;  %s1153_s23 = smov 48   ;;  %vm354_vm8 = vcmask 293888   ;;  %vm358_vm9 = vcmask 359424   ;;  %vm356_vm10 = vcmask 326656   ;;  %vm360_vm11 = vcmask 392192  }
  0x17   : > { %v948_v0 = vld [vmem:[%s1237_s30 + $0x28] sm:$0xf]  ;;  %v947_v1 = vld [vmem:[%s1237_s30 + $0x24] sm:$0xf]  ;;  %v949_v2 = vld [vmem:[%s1237_s30 + $0x2c] sm:$0xf] }
  0x18   : > { %562 = vrot.lane.b32.xlu1 %v948_v0, %s1142_s4  ;;  %558 = vrot.lane.b32.xlu0 %v947_v1, %s1143_s5  ;;  %v967_v3 = vld [vmem:[%s1237_s30 + $0x38] sm:$0xf]  ;;  %v966_v4 = vld [vmem:[%s1237_s30 + $0x34] sm:$0xf]  ;;  %s1154_s26 = smov 52   ;;  %s1155_s27 = smov 56  }
  0x19   : > { %566 = vrot.lane.b32.xlu2 %v949_v2, %s1144_s6  ;;  %v968_v5 = vld [vmem:[%s1237_s30 + $0x3c] sm:$0xf]  ;;  %v969_v6 = vld [vmem:[%s1237_s30 + $0x70] sm:$0xf]  ;;  %v950_v7 = vld [vmem:[%s1237_s30 + $0x60] sm:$0xf] }
  0x1a   : > { %v951_v8 = vld [vmem:[%s1237_s30 + $0x64] sm:$0xf]  ;;  %v952_v9 = vld [vmem:[%s1237_s30 + $0x68] sm:$0xf]  ;;  %v970_v10 = vld [vmem:[%s1237_s30 + $0x74] sm:$0xf] }
  0x1b   : > { %v971_v11 = vld [vmem:[%s1237_s30 + $0x78] sm:$0xf]  ;;  %v928_v12 = vld [vmem:[%s1237_s30 + $0x14] sm:$0xf]  ;;  %v911_v13 = vld [vmem:[%s1237_s30 + $0x4] sm:$0xf] }
  0x1c   : > { %v953_v14 = vld [vmem:[%s1237_s30 + $0x6c] sm:$0xf]  ;;  %v912_v15 = vld [vmem:[%s1237_s30 + $0x8] sm:$0xf]  ;;  %v972_v16 = vld [vmem:[%s1237_s30 + $0x7c] sm:$0xf] }
  0x1d   : > { %v929_v17 = vld [vmem:[%s1237_s30 + $0x18] sm:$0xf]  ;;  %v973_v18 = vld [vmem:[%s1237_s30 + $0xb0] sm:$0xf]  ;;  %v954_v19 = vld [vmem:[%s1237_s30 + $0xa0] sm:$0xf] }
  0x1e   : > { %v913_v20 = vld [vmem:[%s1237_s30 + $0xc] sm:$0xf]  ;;  %v955_v21 = vld [vmem:[%s1237_s30 + $0xa4] sm:$0xf]  ;;  %v930_v22 = vld [vmem:[%s1237_s30 + $0x1c] sm:$0xf] }
  0x1f   : > { %v974_v23 = vld [vmem:[%s1237_s30 + $0xb4] sm:$0xf]  ;;  %v931_v24 = vld [vmem:[%s1237_s30 + $0x50] sm:$0xf]  ;;  %v914_v25 = vld [vmem:[%s1237_s30 + $0x40] sm:$0xf] }
  0x20   : > { %694 = vrot.lane.b32.xlu1 %v967_v3, %s1142_s4  ;;  %690 = vrot.lane.b32.xlu0 %v966_v4, %s1143_s5  ;;  %v956_v26 = vld [vmem:[%s1237_s30 + $0xa8] sm:$0xf]  ;;  %v915_v27 = vld [vmem:[%s1237_s30 + $0x44] sm:$0xf]  ;;  %s1156_s28 = smov 60   ;;  %vm364_vm12 = vcmask 457728  }
  0x21   : > { %698 = vrot.lane.b32.xlu2 %v968_v5, %s1144_s6  ;;  %v975_v28 = vld [vmem:[%s1237_s30 + $0xb8] sm:$0xf]  ;;  %v932_v29 = vld [vmem:[%s1237_s30 + $0x54] sm:$0xf]  ;;  %v976_v30 = vld [vmem:[%s1237_s30 + $0xbc] sm:$0xf] }
  0x22   : > { %v957_v31 = vld [vmem:[%s1237_s30 + $0xac] sm:$0xf]  ;;  %v916_v32 = vld [vmem:[%s1237_s30 + $0x48] sm:$0xf]  ;;  %v958_v33 = vld [vmem:[%s1237_s30 + $0xe0] sm:$0xf] }
  0x23   : > { %v933_v34 = vld [vmem:[%s1237_s30 + $0x58] sm:$0xf]  ;;  %v977_v35 = vld [vmem:[%s1237_s30 + $0xf0] sm:$0xf]  ;;  %v934_v37 = vld [vmem:[%s1237_s30 + $0x5c] sm:$0xf] }
  0x24   : > { %v917_v38 = vld [vmem:[%s1237_s30 + $0x4c] sm:$0xf]  ;;  %v959_v39 = vld [vmem:[%s1237_s30 + $0xe4] sm:$0xf]  ;;  %v918_v41 = vld [vmem:[%s1237_s30 + $0x80] sm:$0xf] }
  0x25   : > { %v978_v42 = vld [vmem:[%s1237_s30 + $0xf4] sm:$0xf]  ;;  %v935_v43 = vld [vmem:[%s1237_s30 + $0x90] sm:$0xf]  ;;  %v979_v45 = vld [vmem:[%s1237_s30 + $0xf8] sm:$0xf] }
  0x26   : > { %v960_v46 = vld [vmem:[%s1237_s30 + $0xe8] sm:$0xf]  ;;  %v919_v47 = vld [vmem:[%s1237_s30 + $0x84] sm:$0xf]  ;;  %v946_v48 = vld [vmem:[%s1237_s30 + $0x20] sm:$0xf] }
  0x27   : > { %v961_v54 = vld [vmem:[%s1237_s30 + $0xec] sm:$0xf]  ;;  %v936_v55 = vld [vmem:[%s1237_s30 + $0x94] sm:$0xf]  ;;  %v980_v57 = vld [vmem:[%s1237_s30 + $0xfc] sm:$0xf] }
  0x28   : > { %702 = vrot.lane.b32.xlu1 %v969_v6, %s1145_s7  ;;  %570 = vrot.lane.b32.xlu0 %v950_v7, %s1145_s7  ;;  %v965_v58 = vld [vmem:[%s1237_s30 + $0x30] sm:$0xf]  ;;  %v937_v0 = vld [vmem:[%s1237_s30 + $0x98] sm:$0xf]  ;;  %vm362_vm13 = vcmask 424960   ;;  %vm366_vm14 = vcmask 490496  }
  0x29   : > { %574 = vrot.lane.b32.xlu2 %v951_v8, %s1146_s8  ;;  %v920_v1 = vld [vmem:[%s1237_s30 + $0x88] sm:$0xf]  ;;  %v921_v3 = vld [vmem:[%s1237_s30 + $0x8c] sm:$0xf]  ;;  %vm368_vm15 = vcmask 523264   ;;  %s207_s29 = sand.u32 1, %s1124_s13  }
  0x30   : > { %578 = vrot.lane.b32.xlu1 %v952_v9, %s1147_s9  ;;  %706 = vrot.lane.b32.xlu0 %v970_v10, %s1146_s8  ;;  %v922_v10 = vld [vmem:[%s1237_s30 + $0xc0] sm:$0xf] }
  0x31   : > { %710 = vrot.lane.b32.xlu2 %v971_v11, %s1147_s9  ;;  %v938_v11 = vld [vmem:[%s1237_s30 + $0x9c] sm:$0xf] }
  0x38   : > { %426 = vrot.lane.b32.xlu1 %v928_v12, %s1143_s5  ;;  %279 = vrot.lane.b32.xlu0 %v911_v13, %s1143_s5  ;;  %v939_v12 = vld [vmem:[%s1237_s30 + $0xd0] sm:$0xf] }
  0x39   : > { %582 = vrot.lane.b32.xlu2 %v953_v14, %s1148_s10 }
  0x40   : > { %283 = vrot.lane.b32.xlu1 %v912_v15, %s1142_s4  ;;  %714 = vrot.lane.b32.xlu0 %v972_v16, %s1148_s10 }
  0x41   : > { %430 = vrot.lane.b32.xlu2 %v929_v17, %s1142_s4 }
  0x48   : > { %718 = vrot.lane.b32.xlu1 %v973_v18, %s1149_s11  ;;  %586 = vrot.lane.b32.xlu0 %v954_v19, %s1149_s11 }
  0x49   : > { %287 = vrot.lane.b32.xlu2 %v913_v20, %s1144_s6  ;;  %v940_v20 = vld [vmem:[%s1237_s30 + $0xd4] sm:$0xf] }
  0x50   : > { %590 = vrot.lane.b32.xlu1 %v955_v21, %s1150_s18  ;;  %434 = vrot.lane.b32.xlu0 %v930_v22, %s1144_s6  ;;  %v923_v21 = vld [vmem:[%s1237_s30 + $0xc4] sm:$0xf]  ;;  %v924_v22 = vld [vmem:[%s1237_s30 + $0xc8] sm:$0xf] }
  0x51   : > { %722 = vrot.lane.b32.xlu2 %v974_v23, %s1150_s18  ;;  %v927_v23 = vld [vmem:[%s1237_s30 + $0x10] sm:$0xf] }
  0x58   : > { %438 = vrot.lane.b32.xlu1 %v931_v24, %s1145_s7  ;;  %291 = vrot.lane.b32.xlu0 %v914_v25, %s1145_s7 }
  0x59   : > { %594 = vrot.lane.b32.xlu2 %v956_v26, %s1151_s19 }
  0x60   : > { %295 = vrot.lane.b32.xlu1 %v915_v27, %s1146_s8  ;;  %726 = vrot.lane.b32.xlu0 %v975_v28, %s1151_s19 }
  0x61   : > { %442 = vrot.lane.b32.xlu2 %v932_v29, %s1146_s8  ;;  %v925_v29 = vld [vmem:[%s1237_s30 + $0xcc] sm:$0xf] }
  0x68   : > { %730 = vrot.lane.b32.xlu1 %v976_v30, %s1152_s21  ;;  %598 = vrot.lane.b32.xlu0 %v957_v31, %s1152_s21  ;;  %v941_v30 = vld [vmem:[%s1237_s30 + $0xd8] sm:$0xf]  ;;  %v247_v31 = vld [vmem:[%s1237_s30] sm:$0xf] }
  0x69   : > { %299 = vrot.lane.b32.xlu2 %v916_v32, %s1147_s9  ;;  %v942_v32 = vld [vmem:[%s1237_s30 + $0xdc] sm:$0xf]  ;;  %s907_s30 = sshll.u32 %s207_s29, 4 }
  0x6a   : > { %s209_s7 = scalar_lea.vmem [#allocation2], %s907_s30 }
  0x70   : > { %602 = vrot.lane.b32.xlu1 %v958_v33, %s1153_s23  ;;  %446 = vrot.lane.b32.xlu0 %v933_v34, %s1147_s9 }
  0x71   : > { %734 = vrot.lane.b32.xlu2 %v977_v35, %s1153_s23 }
  0x73   : > { %v567_v36 = vpop.permute.xlu2 %566 }
  0x78   : > { %450 = vrot.lane.b32.xlu1 %v934_v37, %s1148_s10  ;;  %303 = vrot.lane.b32.xlu0 %v917_v38, %s1148_s10  ;;  %s990_s10 = sshll.u32 %s1132_s15, 4  ;;  %s790_s15 = scalar_lea.sflag [#allocation3], %s207_s29 }
  0x79   : > { %606 = vrot.lane.b32.xlu2 %v959_v39, %s1154_s26 }
  0x7b   : > { %v699_v40 = vpop.permute.xlu2 %698 }
  0x80   : > { %307 = vrot.lane.b32.xlu1 %v918_v41, %s1149_s11  ;;  %738 = vrot.lane.b32.xlu0 %v978_v42, %s1154_s26 }
  0x81   : > { %454 = vrot.lane.b32.xlu2 %v935_v43, %s1149_s11  ;;  %v246_v43 = vld [vmem:[%s1554_s1 + $0x78] sm:$0xff] }
  0x82   : > { %767 = vmatpush.msra.mxu3 %v246_v43  ;;  %635 = vmatpush.msra.mxu2 %v246_v43 }
  0x83   : > { %v575_v44 = vpop.permute.xlu2 %574  ;;  %371 = vmatpush.msra.mxu0 %v246_v43  ;;  %503 = vmatpush.msra.mxu1 %v246_v43 }
  0x88   : > { %742 = vrot.lane.b32.xlu1 %v979_v45, %s1155_s27  ;;  %610 = vrot.lane.b32.xlu0 %v960_v46, %s1155_s27  ;;  %v244_v46 = vld [vmem:[%s1554_s1 + $0x68] sm:$0xff] }
  0x89   : > { %311 = vrot.lane.b32.xlu2 %v919_v47, %s1150_s18 }
  0x8a   : > { %v563_v49 = vpop.permute.xlu1 %562  ;;  %v559_v50 = vpop.permute.xlu0 %558 }
  0x8b   : > { %v617_v51 = vsel %vm338_vm0, %v946_v48, %v559_v50  ;;  %v711_v53 = vpop.permute.xlu2 %710  ;;  %v243_v50 = vld [vmem:[%s1554_s1 + $0x60] sm:$0xff] }
  0x8c   : > { %v618_v52 = vsel %vm340_vm1, %v617_v51, %v563_v49  ;;  %v242_v51 = vld [vmem:[%s1554_s1 + $0x58] sm:$0xff] }
  0x8d   : > { %v619_v56 = vsel %vm342_vm2, %v618_v52, %v567_v36  ;;  %v241_v52 = vld [vmem:[%s1554_s1 + $0x50] sm:$0xff] }
  0x90   : > { %614 = vrot.lane.b32.xlu1 %v961_v54, %s1156_s28  ;;  %458 = vrot.lane.b32.xlu0 %v936_v55, %s1150_s18  ;;  %v240_v54 = vld [vmem:[%s1554_s1 + $0x48] sm:$0xff] }
  0x91   : > { %746 = vrot.lane.b32.xlu2 %v980_v57, %s1156_s28 }
  0x92   : > { %v695_v59 = vpop.permute.xlu1 %694  ;;  %v691_v60 = vpop.permute.xlu0 %690 }
  0x93   : > { %v749_v61 = vsel %vm338_vm0, %v965_v58, %v691_v60  ;;  %v583_v63 = vpop.permute.xlu2 %582 }
  0x94   : > { %v750_v62 = vsel %vm340_vm1, %v749_v61, %v695_v59  ;;  %v239_v59 = vld [vmem:[%s1554_s1 + $0x40] sm:$0xff]  ;;  %v238_v61 = vld [vmem:[%s1554_s1 + $0x38] sm:$0xff] }
  0x95   : > { %v751_v2 = vsel %vm342_vm2, %v750_v62, %v699_v40  ;;  %v237_v62 = vld [vmem:[%s1554_s1 + $0x30] sm:$0xff] }
  0x98   : > { %462 = vrot.lane.b32.xlu1 %v937_v0, %s1151_s19  ;;  %315 = vrot.lane.b32.xlu0 %v920_v1, %s1151_s19  ;;  %s802_s19 = scalar_lea.hbm %s1556_s3, %s990_s10  ;;  %s1082_s10 = scalar_lea.hbm %s1556_s3, 32 }
  0x99   : > { %319 = vrot.lane.b32.xlu2 %v921_v3, %s1152_s21  ;;  %s805_s30 = sshll.u32 %s802_s19, 4  ;;  %s806_s30 = int_to_ptr.hbm [resolvable:$true] %s805_s30 }
  0x9a   : > { %v703_v4 = vpop.permute.xlu1 %702  ;;  %v571_v5 = vpop.permute.xlu0 %570  ;;  %s1076_s4 = sshra.s32 %s806_s30, 4  ;;  %s1077_s4 = int_to_ptr.hbm [resolvable:$true] %s1076_s4 }
  0x9b   : > { %v752_v6 = vsel %vm344_vm3, %v751_v2, %v703_v4  ;;  %v620_v7 = vsel %vm344_vm3, %v619_v56, %v571_v5  ;;  %v431_v9 = vpop.permute.xlu2 %430  ;;  %v235_v4 = vld [vmem:[%s1554_s1 + $0x20] sm:$0xff]  ;;  %s1078_s6 = scalar_lea.hbm %s1077_s4, 16  ;;  %p1083_p1 = scmp.lt.s32.totalorder %s1077_s4, %s1556_s3 }
  0x9c   : > { %v621_v8 = vsel %vm346_vm4, %v620_v7, %v575_v44  ;;  %v245_v44 = vld [vmem:[%s1554_s1 + $0x70] sm:$0xff]  ;;  %p1079_p12 = scmp.ne.s32.totalorder %s1077_s4, %s1078_s6  ;;  %p1084_p2 = scmp.lt.s32.totalorder %s1082_s10, %s1078_s6 }
  0x9d   : > { %768 = vmatpush.msra.mxu3 %v245_v44  ;;  %636 = vmatpush.msra.mxu2 %v245_v44  ;;  %v233_v7 = vld [vmem:[%s1554_s1 + $0x10] sm:$0xff] }
  0x9e   : > { %372 = vmatpush.msra.mxu0 %v245_v44  ;;  %504 = vmatpush.msra.mxu1 %v245_v44  ;;  %p1080_p13 = pnand %p1079_p12, %p1218_p4  ;;  %p1085_p3 = por %p1084_p2, %p1083_p1 }
  0x9f   : > { %769 = vmatpush.msra.mxu3 %v244_v46  ;;  %637 = vmatpush.msra.mxu2 %v244_v46 }
  0xa0   : > { %323 = vrot.lane.b32.xlu1 %v922_v10, %s1153_s23  ;;  %466 = vrot.lane.b32.xlu0 %v938_v11, %s1152_s21  ;;  %s803_s21 = sshll.u32 %s209_s7, 4  ;;  %p1081_p0 = pneg %p1080_p13  ;;  %s804_s21 = int_to_ptr.vmem [resolvable:$true] %s803_s21 }
  0xa1   : > { %470 = vrot.lane.b32.xlu2 %v939_v12, %s1153_s23  ;;  %373 = vmatpush.msra.mxu0 %v244_v46  ;;  %v231_v12 = vld [vmem:[%s1554_s1] sm:$0xff] }
  0xa2   : > { %v579_v13 = vpop.permute.xlu1 %578  ;;  %v707_v14 = vpop.permute.xlu0 %706  ;;  %505 = vmatpush.msra.mxu1 %v244_v46  ;;  %770 = vmatpush.msra.mxu3 %v243_v50  ;;  %p1086_p5 = pnand %p1085_p3, %p1081_p0 }
  0xa3   : > { %v622_v15 = vsel %vm348_vm5, %v621_v8, %v579_v13  ;;  %v753_v16 = vsel %vm346_vm4, %v752_v6, %v707_v14  ;;  %v288_v19 = vpop.permute.xlu2 %287  ;;  %638 = vmatpush.msra.mxu2 %v243_v50  ;;  %374 = vmatpush.msra.mxu0 %v243_v50  ;;  %v234_v6 = vld [vmem:[%s1554_s1 + $0x18] sm:$0xff]  ;;  %v232_v8 = vld [vmem:[%s1554_s1 + $0x8] sm:$0xff] }
  0xa4   : > { %v623_v17 = vsel %vm350_vm6, %v622_v15, %v583_v63  ;;  %v754_v18 = vsel %vm348_vm5, %v753_v16, %v711_v53  ;;  %506 = vmatpush.msra.mxu1 %v243_v50  ;;  %771 = vmatpush.msra.mxu3 %v242_v51  ;;  %v236_v63 = vld [vmem:[%s1554_s1 + $0x28] sm:$0xff] }
  0xa5   : > { %639 = vmatpush.msra.mxu2 %v242_v51  ;;  %375 = vmatpush.msra.mxu0 %v242_v51 }
  0xa6   : > { %507 = vmatpush.msra.mxu1 %v242_v51  ;;  %772 = vmatpush.msra.mxu3 %v241_v52 }
  0xa7   : > { %640 = vmatpush.msra.mxu2 %v241_v52  ;;  %376 = vmatpush.msra.mxu0 %v241_v52 }
  0xa8   : > { %474 = vrot.lane.b32.xlu1 %v940_v20, %s1154_s26  ;;  %327 = vrot.lane.b32.xlu0 %v923_v21, %s1154_s26 }
  0xa9   : > { %331 = vrot.lane.b32.xlu2 %v924_v22, %s1155_s27  ;;  %508 = vmatpush.msra.mxu1 %v241_v52 }
  0xaa   : > { %v427_v24 = vpop.permute.xlu1 %426  ;;  %v280_v25 = vpop.permute.xlu0 %279  ;;  %773 = vmatpush.msra.mxu3 %v240_v54  ;;  %641 = vmatpush.msra.mxu2 %v240_v54 }
  0xab   : > { %v485_v26 = vsel %vm338_vm0, %v927_v23, %v427_v24  ;;  %v1371_v28 = vpop.permute.xlu2 %722  ;;  %v339_v33 = vsel %vm338_vm0, %v247_v31, %v280_v25  ;;  %377 = vmatpush.msra.mxu0 %v240_v54  ;;  %509 = vmatpush.msra.mxu1 %v240_v54  ;;  %vm391_vm0 = vcmask 257024  }
  0xac   : > { %v486_v27 = vsel %vm340_vm1, %v485_v26, %v431_v9  ;;  %774 = vmatpush.msra.mxu3 %v239_v59  ;;  %642 = vmatpush.msra.mxu2 %v239_v59 }
  0xad   : > { %378 = vmatpush.msra.mxu0 %v239_v59  ;;  %510 = vmatpush.msra.mxu1 %v239_v59 }
  0xae   : > { %775 = vmatpush.msra.mxu3 %v238_v61  ;;  %643 = vmatpush.msra.mxu2 %v238_v61 }
  0xaf   : > { %379 = vmatpush.msra.mxu0 %v238_v61  ;;  %511 = vmatpush.msra.mxu1 %v238_v61 }
  0xb0   : > { %335 = vrot.lane.b32.xlu1 %v925_v29, %s1156_s28  ;;  %478 = vrot.lane.b32.xlu0 %v941_v30, %s1155_s27 }
  0xb1   : > { %482 = vrot.lane.b32.xlu2 %v942_v32, %s1156_s28  ;;  %776 = vmatpush.msra.mxu3 %v237_v62 }
  0xb2   : > { %v284_v34 = vpop.permute.xlu1 %283  ;;  %v715_v35 = vpop.permute.xlu0 %714  ;;  %644 = vmatpush.msra.mxu2 %v237_v62  ;;  %380 = vmatpush.msra.mxu0 %v237_v62 }
  0xb3   : > { %v341_v36 = vsel %vm340_vm1, %v339_v33, %v284_v34  ;;  %v1383_v37 = vsel %vm350_vm6, %v754_v18, %v715_v35  ;;  %v1386_v39 = vpop.permute.xlu2 %594  ;;  %512 = vmatpush.msra.mxu1 %v237_v62  ;;  %777 = vmatpush.msra.mxu3 %v236_v63 }
  0xb4   : > { %v343_v38 = vsel %vm342_vm2, %v341_v36, %v288_v19  ;;  %645 = vmatpush.msra.mxu2 %v236_v63  ;;  %381 = vmatpush.msra.mxu0 %v236_v63 }
  0xb5   : > { %513 = vmatpush.msra.mxu1 %v236_v63  ;;  %778 = vmatpush.msra.mxu3 %v235_v4 }
  0xb6   : > { %646 = vmatpush.msra.mxu2 %v235_v4  ;;  %382 = vmatpush.msra.mxu0 %v235_v4 }
  0xb7   : > { %514 = vmatpush.msra.mxu1 %v235_v4  ;;  %779 = vmatpush.msra.mxu3 %v234_v6 }
  0xb8   : > { %647 = vmatpush.msra.mxu2 %v234_v6  ;;  %383 = vmatpush.msra.mxu0 %v234_v6 }
  0xb9   : > { %515 = vmatpush.msra.mxu1 %v234_v6  ;;  %780 = vmatpush.msra.mxu3 %v233_v7 }
  0xba   : > { %v1388_v40 = vpop.permute.xlu1 %718  ;;  %v587_v41 = vpop.permute.xlu0 %586  ;;  %648 = vmatpush.msra.mxu2 %v233_v7  ;;  %384 = vmatpush.msra.mxu0 %v233_v7 }
  0xbb   : > { %v1391_v42 = vsel %vm352_vm7, %v623_v17, %v587_v41  ;;  %v443_v45 = vpop.permute.xlu2 %442  ;;  %516 = vmatpush.msra.mxu1 %v233_v7  ;;  %781 = vmatpush.msra.mxu3 %v232_v8  ;;  %v756_v19 = vsel %vm352_vm7, %v1383_v37, %v1388_v40 }
  0xbc   : > { %649 = vmatpush.msra.mxu2 %v232_v8  ;;  %385 = vmatpush.msra.mxu0 %v232_v8  ;;  %v757_v22 = vsel %vm354_vm8, %v756_v19, %v1371_v28 }
  0xbd   : > { %517 = vmatpush.msra.mxu1 %v232_v8  ;;  %782 = vmatpush.msra.mxu3 %v231_v12  ;;  %v981_v8 = vld [vmem:[%s1555_s2 + $0xc] sm:$0xf] }
  0xbe   : > { %650 = vmatpush.msra.mxu2 %v231_v12  ;;  %386 = vmatpush.msra.mxu0 %v231_v12 }
  0xbf   : > { %518 = vmatpush.msra.mxu1 %v231_v12 }
  0xc2   : > { %v1402_v47 = vpop.permute.xlu1 %590  ;;  %v435_v48 = vpop.permute.xlu0 %434 }
  0xc3   : > { %v487_v49 = vsel %vm342_vm2, %v486_v27, %v435_v48  ;;  %v300_v53 = vpop.permute.xlu2 %299  ;;  %v625_v25 = vsel %vm354_vm8, %v1391_v42, %v1402_v47 }
  0xc4   : > { %v626_v32 = vsel %vm356_vm10, %v625_v25, %v1386_v39 }
  0xca   : > { %v439_v55 = vpop.permute.xlu1 %438  ;;  %v292_v56 = vpop.permute.xlu0 %291 }
  0xcb   : > { %v488_v57 = vsel %vm344_vm3, %v487_v49, %v439_v55  ;;  %v345_v58 = vsel %vm344_vm3, %v343_v38, %v292_v56  ;;  %v735_v0 = vpop.permute.xlu2 %734 }
  0xcc   : > { %v1423_v60 = vsel %vm346_vm4, %v488_v57, %v443_v45 }
  0xd2   : > { %v296_v1 = vpop.permute.xlu1 %295  ;;  %v727_v2 = vpop.permute.xlu0 %726 }
  0xd3   : > { %v347_v3 = vsel %vm346_vm4, %v345_v58, %v296_v1  ;;  %v607_v11 = vpop.permute.xlu2 %606  ;;  %v758_v23 = vsel %vm356_vm10, %v757_v22, %v727_v2 }
  0xd4   : > { %v1439_v5 = vsel %vm348_vm5, %v347_v3, %v300_v53 }
  0xda   : > { %v731_v9 = vpop.permute.xlu1 %730  ;;  %v599_v10 = vpop.permute.xlu0 %598 }
  0xdb   : > { %v455_v15 = vpop.permute.xlu2 %454  ;;  %v759_v24 = vsel %vm358_vm9, %v758_v23, %v731_v9  ;;  %v627_v34 = vsel %vm358_vm9, %v626_v32, %v599_v10 }
  0xdc   : > { %v760_v26 = vsel %vm360_vm11, %v759_v24, %v735_v0 }
  0xe2   : > { %v603_v13 = vpop.permute.xlu1 %602  ;;  %v447_v14 = vpop.permute.xlu0 %446 }
  0xe3   : > { %v312_v18 = vpop.permute.xlu2 %311  ;;  %v628_v35 = vsel %vm360_vm11, %v627_v34, %v603_v13  ;;  %v490_v49 = vsel %vm348_vm5, %v1423_v60, %v447_v14  ;;  %v370_v14 = vld [vmem:[%s1555_s2] sm:$0xf] }
  0xe4   : > { %v629_v36 = vsel %vm362_vm13, %v628_v35, %v607_v11  ;;  %v962_v11 = vld [vmem:[%s1555_s2 + $0x8] sm:$0xf] }
  0xea   : > { %v451_v16 = vpop.permute.xlu1 %450  ;;  %v304_v17 = vpop.permute.xlu0 %303 }
  0xeb   : > { %v747_v27 = vpop.permute.xlu2 %746  ;;  %v351_v47 = vsel %vm350_vm6, %v1439_v5, %v304_v17  ;;  %v491_v51 = vsel %vm350_vm6, %v490_v49, %v451_v16 }
  0xec   : > { %v492_v56 = vsel %vm352_vm7, %v491_v51, %v455_v15  ;;  %v943_v15 = vld [vmem:[%s1555_s2 + $0x4] sm:$0xf] }
  0xf2   : > { %v308_v20 = vpop.permute.xlu1 %307  ;;  %v739_v21 = vpop.permute.xlu0 %738 }
  0xf3   : > { %v761_v29 = vsel %vm362_vm13, %v760_v26, %v739_v21  ;;  %v320_v42 = vpop.permute.xlu2 %319  ;;  %v353_v48 = vsel %vm352_vm7, %v351_v47, %v308_v20 }
  0xf4   : > { %v355_v52 = vsel %vm354_vm8, %v353_v48, %v312_v18 }
  0xfa   : > { %v743_v30 = vpop.permute.xlu1 %742  ;;  %v611_v28 = vpop.permute.xlu0 %610 }
  0xfb   : > { %v762_v31 = vsel %vm364_vm12, %v761_v29, %v743_v30  ;;  %v630_v37 = vsel %vm364_vm12, %v629_v36, %v611_v28  ;;  %v471_v44 = vpop.permute.xlu2 %470 }
  0xfc   : > { %v763_v33 = vsel %vm366_vm14, %v762_v31, %v747_v27 }
  0xfd   : > { %982 = vmatmul.msk.f32.vlgmr.msra.gmra.mxu3 %vm368_vm15, %v763_v33 }
 0x102   : > { %v615_v38 = vpop.permute.xlu1 %614  ;;  %v459_v40 = vpop.permute.xlu0 %458 }
 0x103   : > { %v631_v41 = vsel %vm366_vm14, %v630_v37, %v615_v38  ;;  %v332_v50 = vpop.permute.xlu2 %331  ;;  %v493_v57 = vsel %vm354_vm8, %v492_v56, %v459_v40 }
 0x104   : > { %963 = vmatmul.msk.f32.vlgmr.msra.gmra.mxu2 %vm368_vm15, %v631_v41 }
 0x10a   : > { %v463_v39 = vpop.permute.xlu1 %462  ;;  %v316_v43 = vpop.permute.xlu0 %315 }
 0x10b   : > { %v357_v53 = vsel %vm356_vm10, %v355_v52, %v316_v43  ;;  %v494_v58 = vsel %vm356_vm10, %v493_v57, %v463_v39  ;;  %v483_v0 = vpop.permute.xlu2 %482 }
 0x10c   : > { %v359_v59 = vsel %vm358_vm9, %v357_v53, %v320_v42 }
 0x112   : > { %v324_v45 = vpop.permute.xlu1 %323  ;;  %v467_v46 = vpop.permute.xlu0 %466 }
 0x113   : > { %v361_v60 = vsel %vm360_vm11, %v359_v59, %v324_v45  ;;  %v495_v61 = vsel %vm358_vm9, %v494_v58, %v467_v46 }
 0x114   : > { %v496_v63 = vsel %vm360_vm11, %v495_v61, %v471_v44 }
 0x11a   : > { %v475_v54 = vpop.permute.xlu1 %474  ;;  %v328_v55 = vpop.permute.xlu0 %327 }
 0x11b   : > { %v363_v62 = vsel %vm362_vm13, %v361_v60, %v328_v55  ;;  %v497_v1 = vsel %vm362_vm13, %v496_v63, %v475_v54 }
 0x11c   : > { %v365_v2 = vsel %vm364_vm12, %v363_v62, %v332_v50 }
 0x122   : > { %v336_v3 = vpop.permute.xlu1 %335  ;;  %v479_v4 = vpop.permute.xlu0 %478 }
 0x123   : > { %v498_v5 = vsel %vm364_vm12, %v497_v1, %v479_v4  ;;  %v367_v6 = vsel %vm366_vm14, %v365_v2, %v336_v3 }
 0x124   : > { %926 = vmatmul.msk.f32.vlgmr.msra.gmra.mxu0 %vm368_vm15, %v367_v6  ;;  %v499_v7 = vsel %vm366_vm14, %v498_v5, %v483_v0 }
 0x125   : > { %944 = vmatmul.msk.f32.vlgmr.msra.gmra.mxu1 %vm368_vm15, %v499_v7 }
 0x180   : > { %v784_v9 = vpop.f32.mrf.mxu3 }
 0x181   : > { %v785_v10 = vadd.f32 %v981_v8, %v784_v9 }
 0x183   : > { %983 = vst.msk [vmem:[%s209_s7 + $0xc] sm:$0xf] %vm391_vm0, %v785_v10 }
 0x187   : > { %v652_v12 = vpop.f32.mrf.mxu2 }
 0x188   : > { %v653_v13 = vadd.f32 %v962_v11, %v652_v12 }
 0x18a   : > { %964 = vst.msk [vmem:[%s209_s7 + $0x8] sm:$0xf] %vm391_vm0, %v653_v13 }
 0x1a1   : > { %v388_v16 = vpop.f32.mrf.mxu0 }
 0x1a2   : > { %v389_v17 = vadd.f32 %v388_v16, %v370_v14  ;;  %v520_v18 = vpop.f32.mrf.mxu1 }
 0x1a3   : > { %v521_v19 = vadd.f32 %v943_v15, %v520_v18 }
 0x1a4   : > { %392 = vst.msk [vmem:[%s209_s7] sm:$0xf] %vm391_vm0, %v389_v17 }
 0x1a5   : > { %945 = vst.msk [vmem:[%s209_s7 + $0x4] sm:$0xf] %vm391_vm0, %v521_v19 }
 0x1a6   : > { %1089 = shalt.err (!%p1086_p5)
}
 0x1a7   : > { %s1157_s29 = smov 64  }
 0x1a8   : > { %991 = dma.vmem_to_hbm [thread:$0]  (%p1218_p4), %s804_s21, 256, %s806_s30, %s790_s15, %s1157_s29, %s1157_s29, %s1143_s5  }
 0x1a9 PF: > { %p997_p6 = scmp.ge.s32.totalorder %s1140_s17, 2  ;;  %s820_s7 = sand.u32 1, %s1120_s12  }
 0x1aa   : > { %s821_s19 = scalar_lea.sflag [#allocation3], %s820_s7 }
 0x1ab   : > { %p994_p7 = pnand %p997_p6, %p1225_p8 }
 0x1ad   : > { %p995_p9 = pneg %p994_p7 }
 0x1af   : > { %1115 = dma.done.wait (%p995_p9), %s821_s19, 256  }
 0x1b0   : > { %1117 = vsyncadd (%p995_p9), %s821_s19, 4294967040  ;;  %s16_s17 = sadd.s32 1, %s1140_s17   ;;  %s1559_s12 = smov %s1124_s13 }
 0x1b1   : > { %p13_p10 = scmp.ge.s32.totalorder %s16_s17, 4   ;;  %s1560_s13 = smov %s1128_s14 }
 0x1b2   : > { %s1561_s14 = smov %s1231_s25  ;;  %s1562_s15 = smov %s1136_s16 }
 0x1b3   : > { %s1563_s16 = smov %s1565_s20  ;;  %15 = sbr.rel (!%p13_p10) target bundleno = 4 (0x4), region = 139 }
 0x1b8   :  { %827 = vsyncpa [#allocation3], 1 }
 0x1b9   :  { %829 = vsyncpa [#allocation3 + $0x1], 1 }

// kernel: tpu_custom_call.1
= control target key start
LH: loop header
LB: loop body
LE: loop exit
PB: predicated region body
PF: predicated region fallthrough
CT: control target
= control target key end

     0   :  { %8 = vsyncpa [#allocation3], 0  ;;  %s780_s0 = inlined_call_operand.vmem [shape: f32[8,4,128], index: 0, kind: input, shape index: {}]   ;;  %s781_s1 = inlined_call_operand.vmem [shape: f32[128,32], index: 1, kind: input, shape index: {}]   ;;  %s782_s2 = inlined_call_operand.vmem [shape: f32[4,4,32], index: 2, kind: input, shape index: {}]   ;;  %s783_s3 = inlined_call_operand.hbm [shape: f32[8,4,32], index: 3, kind: output, shape index: {}]  }
   0x1   :  { %10 = vsyncpa [#allocation3 + $0x1], 0  ;;  %s620_s12 = smov 0   ;;  %s622_s13 = smov 0  }
   0x2   :  { %s624_s14 = smov 0   ;;  %s626_s15 = smov 0  }
   0x3   :  { %s628_s16 = smov 0   ;;  %s630_s17 = smov 0  }
   0x4 LB: > { %s437_s18 = sadd.s32 4294967295, %s596_s17   ;;  %s438_s19 = sadd.s32 4294967294, %s596_s17   ;;  %s596_s17 = sphi %s630_s17, %s16_s17   ;;  %s592_s16 = sphi %s628_s16, %s790_s16   ;;  %s588_s15 = sphi %s626_s15, %s789_s15   ;;  %s584_s14 = sphi %s624_s14, %s788_s14   ;;  %s580_s13 = sphi %s622_s13, %s787_s13   ;;  %s576_s12 = sphi %s620_s12, %s786_s12  }
   0x5   : > { %s28_s20 = sadd.s32 1, %s592_s16  ;;  %s112_s21 = sadd.s32 1, %s584_s14 }
   0x6   : > { %p30_p0 = scmp.ge.s32.totalorder %s28_s20, 2  ;;  %p122_p1 = scmp.ne.s32.totalorder %s584_s14, %s580_s13 }
   0x7   : > { %p123_p2 = scmp.eq.s32.totalorder %s437_s18, 1  ;;  %p128_p3 = scmp.ne.s32.totalorder %s580_s13, %s576_s12 }
   0x8   : > { %s792_s20 = smov (%p30_p0, %s28_s20), 0  ;;  %p129_p5 = scmp.eq.s32.totalorder %s438_s19, 1 }
   0x9   : > { %p660_p4 = por %p123_p2, %p122_p1  ;;  %s109_s23 = ssub.s32 %s592_s16, %s792_s20 }
   0xa   : > { %p442_p6 = scmp.ge.s32.totalorder %s596_s17, 1  ;;  %p110_p7 = scmp.eq.s32.totalorder %s109_s23, 0 }
   0xb   : > { %p667_p8 = por %p129_p5, %p128_p3  ;;  %p170_p9 = scmp.lt.s32.totalorder %s596_s17, 3 }
   0xc   : > { %s673_s25 = scalar_select %p110_p7, %s584_s14, %s112_s21  }
   0xd   : > { %p171_p10 = pnand %p442_p6, %p170_p9 }
   0xe   : > { %s444_s23 = sshll.u32 (!%p171_p10), %s588_s15, 2  ;;  %s197_s29 = sand.u32 (!%p171_p10), 1, %s580_s13  }
   0xf   : > { %174 = sbr.rel (%p171_p10) target bundleno = 191 (0xbf), region = 32  ;;  %p202_p11 = scmp.lt.s32.totalorder (!%p171_p10), %s444_s23, 7 }
  0x10   : > { %s443_s30 = sshll.u32 (!%p171_p10), %s197_s29, 4  ;;  %s460_s4 = sshll.u32 (!%p171_p10), %s588_s15, 4 }
  0x11   : > { %s347_s11 = scalar_lea.hbm (!%p171_p10), %s783_s3, %s460_s4  ;;  %s199_s18 = scalar_lea.vmem (!%p171_p10), [#allocation2], %s443_s30 }
  0x12   : > { %s348_s19 = sshll.u32 (!%p171_p10), %s199_s18, 4  ;;  %s335_s28 = scalar_lea.sflag (!%p171_p10), [#allocation3], %s197_s29  ;;  %s349_s19 = int_to_ptr.vmem [resolvable:$true] %s348_s19 }
  0x13   : > { %s538_s7 = scalar_lea.hbm (!%p171_p10), %s783_s3, 32 }
  0x14   : > { %v231_v0 = vld [vmem:[%s781_s1 + $0x78] sm:$0xff]  ;;  %v230_v1 = vld [vmem:[%s781_s1 + $0x70] sm:$0xff]  ;;  %v229_v2 = vld [vmem:[%s781_s1 + $0x68] sm:$0xff]  ;;  %s794_s23 = smov (!%p202_p11, %s444_s23), 7  ;;  %vm254_vm0 = vcmask 257024  }
  0x15   : > { %286 = vmatpush.msra.mxu2 %v231_v0  ;;  %312 = vmatpush.msra.mxu3 %v231_v0  ;;  %v228_v3 = vld [vmem:[%s781_s1 + $0x60] sm:$0xff]  ;;  %v227_v4 = vld [vmem:[%s781_s1 + $0x58] sm:$0xff]  ;;  %v226_v5 = vld [vmem:[%s781_s1 + $0x50] sm:$0xff]  ;;  %s445_s9 = sshll.u32 %s794_s23, 2  ;;  %s350_s23 = sshll.u32 %s347_s11, 4  ;;  %s351_s23 = int_to_ptr.hbm [resolvable:$true] %s350_s23 }
  0x16   : > { %234 = vmatpush.msra.mxu0 %v231_v0  ;;  %260 = vmatpush.msra.mxu1 %v231_v0  ;;  %v225_v6 = vld [vmem:[%s781_s1 + $0x48] sm:$0xff]  ;;  %v224_v7 = vld [vmem:[%s781_s1 + $0x40] sm:$0xff]  ;;  %v223_v8 = vld [vmem:[%s781_s1 + $0x38] sm:$0xff]  ;;  %s205_s27 = scalar_lea.vmem %s780_s0, %s445_s9  ;;  %s532_s30 = sshra.s32 %s351_s23, 4  ;;  %s533_s30 = int_to_ptr.hbm [resolvable:$true] %s532_s30 }
  0x17   : > { %287 = vmatpush.msra.mxu2 %v230_v1  ;;  %313 = vmatpush.msra.mxu3 %v230_v1  ;;  %v222_v9 = vld [vmem:[%s781_s1 + $0x30] sm:$0xff]  ;;  %v221_v10 = vld [vmem:[%s781_s1 + $0x28] sm:$0xff]  ;;  %v220_v11 = vld [vmem:[%s781_s1 + $0x20] sm:$0xff]  ;;  %s534_s4 = scalar_lea.hbm %s533_s30, 16  ;;  %p539_p1 = scmp.lt.s32.totalorder %s533_s30, %s783_s3 }
  0x18   : > { %235 = vmatpush.msra.mxu0 %v230_v1  ;;  %261 = vmatpush.msra.mxu1 %v230_v1  ;;  %v219_v12 = vld [vmem:[%s781_s1 + $0x18] sm:$0xff]  ;;  %v218_v13 = vld [vmem:[%s781_s1 + $0x10] sm:$0xff]  ;;  %v217_v14 = vld [vmem:[%s781_s1 + $0x8] sm:$0xff]  ;;  %p535_p12 = scmp.ne.s32.totalorder %s533_s30, %s534_s4  ;;  %p540_p2 = scmp.lt.s32.totalorder %s538_s7, %s534_s4 }
  0x19   : > { %288 = vmatpush.msra.mxu2 %v229_v2  ;;  %314 = vmatpush.msra.mxu3 %v229_v2  ;;  %v216_v15 = vld [vmem:[%s781_s1] sm:$0xff]  ;;  %v449_v16 = vld [vmem:[%s205_s27 + $0x8] sm:$0xf]  ;;  %v452_v17 = vld [vmem:[%s205_s27 + $0xc] sm:$0xf] }
  0x1a   : > { %236 = vmatpush.msra.mxu0 %v229_v2  ;;  %262 = vmatpush.msra.mxu1 %v229_v2  ;;  %v232_v18 = vld [vmem:[%s205_s27] sm:$0xf]  ;;  %v446_v19 = vld [vmem:[%s205_s27 + $0x4] sm:$0xf]  ;;  %v450_v26 = vld [vmem:[%s782_s2 + $0x8] sm:$0xf]  ;;  %p536_p13 = pnand %p535_p12, %p660_p4  ;;  %p541_p3 = por %p540_p2, %p539_p1 }
  0x1b   : > { %289 = vmatpush.msra.mxu2 %v228_v3  ;;  %315 = vmatpush.msra.mxu3 %v228_v3  ;;  %v233_v20 = vld [vmem:[%s782_s2] sm:$0xf]  ;;  %v447_v21 = vld [vmem:[%s782_s2 + $0x4] sm:$0xf]  ;;  %v453_v27 = vld [vmem:[%s782_s2 + $0xc] sm:$0xf] }
  0x1c   : > { %237 = vmatpush.msra.mxu0 %v228_v3  ;;  %263 = vmatpush.msra.mxu1 %v228_v3  ;;  %p537_p0 = pneg %p536_p13 }
  0x1d   : > { %290 = vmatpush.msra.mxu2 %v227_v4  ;;  %316 = vmatpush.msra.mxu3 %v227_v4 }
  0x1e   : > { %238 = vmatpush.msra.mxu0 %v227_v4  ;;  %264 = vmatpush.msra.mxu1 %v227_v4  ;;  %p542_p5 = pnand %p541_p3, %p537_p0 }
  0x1f   : > { %291 = vmatpush.msra.mxu2 %v226_v5  ;;  %317 = vmatpush.msra.mxu3 %v226_v5 }
  0x20   : > { %239 = vmatpush.msra.mxu0 %v226_v5  ;;  %265 = vmatpush.msra.mxu1 %v226_v5 }
  0x21   : > { %292 = vmatpush.msra.mxu2 %v225_v6  ;;  %318 = vmatpush.msra.mxu3 %v225_v6 }
  0x22   : > { %240 = vmatpush.msra.mxu0 %v225_v6  ;;  %266 = vmatpush.msra.mxu1 %v225_v6 }
  0x23   : > { %293 = vmatpush.msra.mxu2 %v224_v7  ;;  %319 = vmatpush.msra.mxu3 %v224_v7 }
  0x24   : > { %241 = vmatpush.msra.mxu0 %v224_v7  ;;  %267 = vmatpush.msra.mxu1 %v224_v7 }
  0x25   : > { %294 = vmatpush.msra.mxu2 %v223_v8  ;;  %320 = vmatpush.msra.mxu3 %v223_v8 }
  0x26   : > { %242 = vmatpush.msra.mxu0 %v223_v8  ;;  %268 = vmatpush.msra.mxu1 %v223_v8 }
  0x27   : > { %295 = vmatpush.msra.mxu2 %v222_v9  ;;  %321 = vmatpush.msra.mxu3 %v222_v9 }
  0x28   : > { %243 = vmatpush.msra.mxu0 %v222_v9  ;;  %269 = vmatpush.msra.mxu1 %v222_v9 }
  0x29   : > { %296 = vmatpush.msra.mxu2 %v221_v10  ;;  %322 = vmatpush.msra.mxu3 %v221_v10 }
  0x2a   : > { %244 = vmatpush.msra.mxu0 %v221_v10  ;;  %270 = vmatpush.msra.mxu1 %v221_v10 }
  0x2b   : > { %297 = vmatpush.msra.mxu2 %v220_v11  ;;  %323 = vmatpush.msra.mxu3 %v220_v11 }
  0x2c   : > { %245 = vmatpush.msra.mxu0 %v220_v11  ;;  %271 = vmatpush.msra.mxu1 %v220_v11 }
  0x2d   : > { %298 = vmatpush.msra.mxu2 %v219_v12  ;;  %324 = vmatpush.msra.mxu3 %v219_v12 }
  0x2e   : > { %246 = vmatpush.msra.mxu0 %v219_v12  ;;  %272 = vmatpush.msra.mxu1 %v219_v12 }
  0x2f   : > { %299 = vmatpush.msra.mxu2 %v218_v13  ;;  %325 = vmatpush.msra.mxu3 %v218_v13 }
  0x30   : > { %247 = vmatpush.msra.mxu0 %v218_v13  ;;  %273 = vmatpush.msra.mxu1 %v218_v13 }
  0x31   : > { %300 = vmatpush.msra.mxu2 %v217_v14  ;;  %326 = vmatpush.msra.mxu3 %v217_v14 }
  0x32   : > { %248 = vmatpush.msra.mxu0 %v217_v14  ;;  %274 = vmatpush.msra.mxu1 %v217_v14 }
  0x33   : > { %301 = vmatpush.msra.mxu2 %v216_v15  ;;  %327 = vmatpush.msra.mxu3 %v216_v15 }
  0x34   : > { %302 = vmatmul.f32.vlgmr.msra.gmra.mxu2 %v449_v16  ;;  %328 = vmatmul.f32.vlgmr.msra.gmra.mxu3 %v452_v17 }
  0x35   : > { %249 = vmatpush.msra.mxu0 %v216_v15  ;;  %275 = vmatpush.msra.mxu1 %v216_v15 }
  0x36   : > { %250 = vmatmul.f32.vlgmr.msra.gmra.mxu0 %v232_v18  ;;  %276 = vmatmul.f32.vlgmr.msra.gmra.mxu1 %v446_v19 }
  0xb3   : > { %v251_v22 = vpop.f32.mrf.mxu0  ;;  %v277_v23 = vpop.f32.mrf.mxu1 }
  0xb4   : > { %v252_v24 = vadd.f32 %v251_v22, %v233_v20  ;;  %v278_v25 = vadd.f32 %v447_v21, %v277_v23 }
  0xb6   : > { %255 = vst.msk [vmem:[%s199_s18] sm:$0xf] %vm254_vm0, %v252_v24 }
  0xb7   : > { %448 = vst.msk [vmem:[%s199_s18 + $0x4] sm:$0xf] %vm254_vm0, %v278_v25  ;;  %v303_v28 = vpop.f32.mrf.mxu2  ;;  %v329_v29 = vpop.f32.mrf.mxu3 }
  0xb8   : > { %v304_v30 = vadd.f32 %v450_v26, %v303_v28  ;;  %v330_v31 = vadd.f32 %v453_v27, %v329_v29 }
  0xba   : > { %451 = vst.msk [vmem:[%s199_s18 + $0x8] sm:$0xf] %vm254_vm0, %v304_v30 }
  0xbb   : > { %454 = vst.msk [vmem:[%s199_s18 + $0xc] sm:$0xf] %vm254_vm0, %v330_v31 }
  0xbc   : > { %545 = shalt.err (!%p542_p5)
}
  0xbd   : > { %s598_s29 = smov 64   ;;  %s599_s10 = smov 4  }
  0xbe   : > { %461 = dma.vmem_to_hbm [thread:$0]  (%p660_p4), %s349_s19, 256, %s351_s23, %s335_s28, %s598_s29, %s598_s29, %s599_s10  }
  0xbf PF: > { %p467_p6 = scmp.ge.s32.totalorder %s596_s17, 2  ;;  %s365_s11 = sand.u32 1, %s576_s12  }
  0xc0   : > { %s366_s18 = scalar_lea.sflag [#allocation3], %s365_s11 }
  0xc1   : > { %p464_p7 = pnand %p467_p6, %p667_p8 }
  0xc3   : > { %p465_p9 = pneg %p464_p7 }
  0xc5   : > { %571 = dma.done.wait (%p465_p9), %s366_s18, 256  }
  0xc6   : > { %573 = vsyncadd (%p465_p9), %s366_s18, 4294967040  ;;  %s16_s17 = sadd.s32 1, %s596_s17   ;;  %s786_s12 = smov %s580_s13 }
  0xc7   : > { %p13_p10 = scmp.ge.s32.totalorder %s16_s17, 4   ;;  %s787_s13 = smov %s584_s14 }
  0xc8   : > { %s788_s14 = smov %s673_s25  ;;  %s789_s15 = smov %s592_s16 }
  0xc9   : > { %s790_s16 = smov %s792_s20  ;;  %15 = sbr.rel (!%p13_p10) target bundleno = 4 (0x4), region = 79 }
  0xce   :  { %372 = vsyncpa [#allocation3], 1 }
  0xcf   :  { %374 = vsyncpa [#allocation3 + $0x1], 1 }

</bundles_post_ra>
